<compile_context>
chip_gen: v7x
topology: tpu7x:2x2x1
jax: 0.10.0
libtpu: 0.0.40
codegen_flags: <defaults>
</compile_context>

<pallas_src>
import functools

import jax
import jax.numpy as jnp
from jax.experimental import pallas as pl
from jax.experimental.pallas import tpu as pltpu


# ---------------------------------------------------------------------------
# Optional single-buffering of resident blocks (probe once at runtime; the
# pipeline_mode API is new, so fall back to default double buffering if it is
# rejected or miscompiles).
# ---------------------------------------------------------------------------
_UNSET = object()
_BUFFERED_ONE_CACHE = _UNSET


def _buffered_one():
    """Return pl.Buffered(1) if supported (resident blocks need no 2nd buffer),
    else None."""
    global _BUFFERED_ONE_CACHE
    if _BUFFERED_ONE_CACHE is _UNSET:
        try:
            def _probe(a_ref, b_ref, o_ref):
                o_ref[0] = a_ref[0].astype(jnp.float32) + b_ref[0]

            a = jnp.ones((2, 8, 128), jnp.bfloat16)
            b = jnp.arange(2 * 8 * 256, dtype=jnp.float32).reshape(2, 8, 256)
            out = pl.pallas_call(
                _probe,
                out_shape=jax.ShapeDtypeStruct((2, 8, 256), jnp.float32),
                grid=(2, 2),
                in_specs=[
                    pl.BlockSpec((1, 8, 128), lambda i, j: (i, 0, 0),
                                 pipeline_mode=pl.Buffered(1)),
                    pl.BlockSpec((1, 8, 128), lambda i, j: (i, 0, j)),
                ],
                out_specs=pl.BlockSpec((1, 8, 128), lambda i, j: (i, 0, j)),
                compiler_params=pltpu.CompilerParams(
                    dimension_semantics=("parallel", "parallel")),
            )(a, b)
            out = jax.block_until_ready(out)
            good = bool(jnp.max(jnp.abs(out - (b + 1.0))) == 0.0)
            _BUFFERED_ONE_CACHE = pl.Buffered(1) if good else None
        except Exception:
            _BUFFERED_ONE_CACHE = None
    return _BUFFERED_ONE_CACHE


def _spec(shape, index_map, buffered=None):
    if buffered is not None:
        return pl.BlockSpec(shape, index_map, pipeline_mode=buffered)
    return pl.BlockSpec(shape, index_map)


# ---------------------------------------------------------------------------
# Generation-aware VMEM budget and tile selection
# ---------------------------------------------------------------------------
def _vmem_limit_bytes():
    """~100 MiB on 128-MiB parts (v5e/v6e), capacity-16MiB (=48 MiB) on v7x,
    conservative 48 MiB if the capacity query is unavailable."""
    cap = 64 * 2 ** 20
    try:
        cap = int(getattr(pltpu.get_tpu_info(), "vmem_capacity_bytes", cap))
    except Exception:
        pass
    return max(32 * 2 ** 20, min(cap - 16 * 2 ** 20, 100 * 2 ** 20))


def _pick_attn_tq(n_pad, c, p, limit):
    budget = int(0.6 * limit)
    nbuf = 1 if _buffered_one() is not None else 2
    resident = nbuf * ((c + p) * n_pad * 2 + n_pad * 4) + (p * p + p * c + p) * 4
    for tq in (512, 256, 128):
        if n_pad % tq:
            continue
        temps = tq * n_pad * (4 + 4 + 2)            # logits, p (f32), sm (bf16)
        tiles = 2 * tq * (c * 2 + c * 4 + p * 4)    # q / x / out tiles (2 bufs)
        if resident + temps + tiles <= budget:
            return tq
    return 128


def _pick_conv_tn(n_pad, ck, ctot, limit):
    budget = int(0.6 * limit)
    nbuf = 1 if _buffered_one() is not None else 2
    resident = nbuf * (ctot * ck * 2 + ctot * 4)
    for tn in (1024, 512, 256, 128):
        if n_pad % tn:
            continue
        tiles = 2 * tn * (ck * 2 + ctot * 2)
        if resident + tiles <= budget:
            return tn
    return 128


# ---------------------------------------------------------------------------
# Pallas kernel 1: fused conv-as-matmul (q / ok / rel_key convs in one pass),
# tiled over the spatial (lane) axis. Output kept in bf16 in HBM.
# ---------------------------------------------------------------------------
def _conv_matmul_kernel(w_ref, b_ref, p_ref, o_ref):
    # w: (Ctot, Cin*9) bf16, b: (Ctot, 1) f32,
    # p: (1, Cin*9, TN) bf16, o: (1, Ctot, TN) bf16
    acc = jnp.dot(w_ref[...], p_ref[0], preferred_element_type=jnp.float32)
    o_ref[0] = (acc + b_ref[...]).astype(jnp.bfloat16)


def pallas_fused_conv(w_all, b_all, patches, *, tn, vmem_limit):
    B, Ck, Np = patches.shape
    Ctot = w_all.shape[0]
    res = _buffered_one()
    return pl.pallas_call(
        _conv_matmul_kernel,
        out_shape=jax.ShapeDtypeStruct((B, Ctot, Np), jnp.bfloat16),
        grid=(B, Np // tn),
        in_specs=[
            _spec((Ctot, Ck), lambda b, j: (0, 0), res),        # weights (resident)
            _spec((Ctot, 1), lambda b, j: (0, 0), res),         # bias    (resident)
            pl.BlockSpec((1, Ck, tn), lambda b, j: (b, 0, j)),  # patches tile
        ],
        out_specs=pl.BlockSpec((1, Ctot, tn), lambda b, j: (b, 0, j)),
        compiler_params=pltpu.CompilerParams(
            dimension_semantics=("parallel", "parallel"),
            vmem_limit_bytes=vmem_limit),
    )(w_all, b_all, patches)


# ---------------------------------------------------------------------------
# Pallas kernel 2: fused dual attention + shortcut + 1x1 value conv,
# tiled over query blocks (output spatial tiles). No cross-tile state.
# ---------------------------------------------------------------------------
def _da_attention_kernel(gs_ref, mask_ref, q_ref, ok_ref, x_ref, y_ref,
                         wv_ref, wc_ref, bv_ref, o_ref):
    tq = o_ref.shape[2]

    # ---- spatial attention for this query tile (never the full N x N).
    # logits[q, k] = sum_c proj_query[c, q] * obj_key[c, k]  (bf16 MXU, f32 acc)
    logits = jax.lax.dot_general(
        q_ref[0], ok_ref[0], (((0,), (0,)), ((), ())),
        preferred_element_type=jnp.float32)                     # (TQ, Npad) f32
    logits = logits + mask_ref[...]                             # -1e30 on padded keys
    m = jnp.max(logits, axis=-1, keepdims=True)
    p = jnp.exp(logits - m)
    inv = pl.reciprocal(jnp.sum(p, axis=-1, keepdims=True), approx=True)
    sm = (p * inv).astype(jnp.bfloat16)                         # (TQ, Npad) bf16

    # torch.bmm(y, spatial_attention) restricted to this query tile:
    #   out_sp[:, tile] = y_full @ sm_tile^T  -> (2Co, TQ), f32 accumulation
    out_sp = jax.lax.dot_general(
        y_ref[0], sm, (((1,), (1,)), ((), ())),
        preferred_element_type=jnp.float32)

    # shortcut tile from the resident bf16 y (aligned lane slice)
    start = pl.multiple_of(pl.program_id(1) * tq, tq)
    y_tile = y_ref[0, :, pl.ds(start, tq)].astype(jnp.float32)

    # 1x1 value conv; channel path pre-folded into Wc = gamma_c * (Wv@dup) @ CA:
    #   out = Wv @ (gamma_s * out_sp + y) + Wc @ x + b_v
    pre = gs_ref[0] * out_sp + y_tile
    o_ref[0] = (jnp.dot(wv_ref[...], pre, preferred_element_type=jnp.float32)
                + jnp.dot(wc_ref[0], x_ref[0],
                          preferred_element_type=jnp.float32)
                + bv_ref[...])


def pallas_da_attention(gamma_s, mask_row, q, ok, xflat, yflat, wv, wc, bv,
                        *, tq, vmem_limit):
    B, C, Np = q.shape
    P = yflat.shape[1]
    res = _buffered_one()
    return pl.pallas_call(
        _da_attention_kernel,
        out_shape=jax.ShapeDtypeStruct((B, P, Np), jnp.float32),
        grid=(B, Np // tq),
        in_specs=[
            pl.BlockSpec(memory_space=pltpu.MemorySpace.SMEM),  # gamma_spatial (1,)
            _spec((1, Np), lambda b, j: (0, 0), res),           # additive key mask
            pl.BlockSpec((1, C, tq), lambda b, j: (b, 0, j)),   # proj_query tile (bf16)
            _spec((1, C, Np), lambda b, j: (b, 0, 0), res),     # obj_proj_key (bf16, resident)
            pl.BlockSpec((1, C, tq), lambda b, j: (b, 0, j)),   # x tile (f32)
            _spec((1, P, Np), lambda b, j: (b, 0, 0), res),     # y shortcut (bf16, resident)
            _spec((P, P), lambda b, j: (0, 0), res),            # value conv W
            _spec((1, P, C), lambda b, j: (b, 0, 0), res),      # folded channel matrix Wc
            _spec((P, 1), lambda b, j: (0, 0), res),            # value conv bias
        ],
        out_specs=pl.BlockSpec((1, P, tq), lambda b, j: (b, 0, j)),
        compiler_params=pltpu.CompilerParams(
            dimension_semantics=("parallel", "parallel"),
            vmem_limit_bytes=vmem_limit),
    )(gamma_s, mask_row, q, ok, xflat, yflat, wv, wc, bv)


# ---------------------------------------------------------------------------
# Glue (plain JAX): im2col, padding, channel-attention fold, wrapper
# ---------------------------------------------------------------------------
def im2col_dilated3x3(x):
    """3x3 conv, stride 1, padding 2, dilation 2 -> same spatial size."""
    B, C, H, W = x.shape
    xp = jnp.pad(x, ((0, 0), (0, 0), (2, 2), (2, 2)))
    cols = []
    for ky in range(3):
        for kx in range(3):
            cols.append(xp[:, :, 2 * ky:2 * ky + H, 2 * kx:2 * kx + W])
    patches = jnp.stack(cols, axis=2)            # (B, C, 9, H, W)
    return patches.reshape(B, C * 9, H * W)


def da_module_forward(x, y, params, *, tq=None, tn=None):
    B, C, H, W = x.shape
    Co = params["w_rel"].shape[0]
    P = 2 * Co
    N = H * W
    n_pad = -(-N // 128) * 128                   # lane-pad N to a multiple of 128
    pad = n_pad - N
    Ctot = 2 * C + Co
    Ck = C * 9

    vmem_limit = _vmem_limit_bytes()
    tn = tn or _pick_conv_tn(n_pad, Ck, Ctot, vmem_limit)
    tq = tq or _pick_attn_tq(n_pad, C, P, vmem_limit)

    # ---- fused dilated-conv matmul: [w_q; w_ok; w_rel] @ patches (bf16, read once).
    patches = im2col_dilated3x3(x.astype(jnp.bfloat16))          # (B, C*9, N) bf16
    if pad:
        patches = jnp.pad(patches, ((0, 0), (0, 0), (0, pad)))
    w_all = jnp.concatenate(
        [params["w_q"].reshape(C, Ck),
         params["w_ok"].reshape(C, Ck),
         params["w_rel"].reshape(Co, Ck)], axis=0).astype(jnp.bfloat16)
    b_all = jnp.concatenate(
        [params["b_q"], params["b_ok"], params["b_rel"]]
    ).reshape(-1, 1).astype(jnp.float32)
    qkr = pallas_fused_conv(w_all, b_all, patches, tn=tn, vmem_limit=vmem_limit)
    q, ok = qkr[:, :C], qkr[:, C:2 * C]
    rk = qkr[:, 2 * C:2 * C + Co]
    # No masking of the padded tail is needed: padded key columns get the
    # additive -1e30 mask in the attention kernel, padded query columns are
    # cropped at the end, and the channel path below contracts only over [:N].

    # ---- channel attention (tiny) exactly in f32, folded with gamma_channel,
    # repeat_interleave(2, dim=1) and the 1x1 value conv into Wc (B, P, C).
    hp = jax.lax.Precision.HIGHEST
    cl = jnp.einsum("bpn,bcn->bpc", rk[:, :, :N].astype(jnp.float32),
                    q[:, :, :N].astype(jnp.float32), precision=hp)
    ca = jax.nn.softmax(cl, axis=-1)                              # (B, Co, C)
    wv = params["w_v"].reshape(P, P).astype(jnp.float32)
    wv_dup = wv.reshape(P, Co, 2).sum(axis=-1)   # fold repeat_interleave(2, dim=1)
    wc = (jnp.asarray(params["gamma_channel"], jnp.float32)
          * jnp.einsum("pq,bqc->bpc", wv_dup, ca, precision=hp))  # (B, P, C)
    bv = params["b_v"].reshape(P, 1).astype(jnp.float32)

    xflat = x.reshape(B, C, N).astype(jnp.float32)
    yflat = y.reshape(B, P, N).astype(jnp.bfloat16)
    if pad:
        xflat = jnp.pad(xflat, ((0, 0), (0, 0), (0, pad)))
        yflat = jnp.pad(yflat, ((0, 0), (0, 0), (0, pad)))
    mask_row = jnp.where(jnp.arange(n_pad) < N, 0.0, -1e30
                         ).astype(jnp.float32)[None, :]
    gamma_s = jnp.asarray(params["gamma_spatial"], jnp.float32).reshape(1)

    out = pallas_da_attention(gamma_s, mask_row, q, ok, xflat, yflat,
                              wv, wc, bv, tq=tq, vmem_limit=vmem_limit)
    return out[:, :, :N].reshape(B, P, H, W)


def init_params(key, in_dim, out_dim):
    ks = jax.random.split(key, 8)

    def conv_w(k, cout, cin, kh, kw, scale=0.1):
        return scale * jax.random.normal(k, (cout, cin, kh, kw), jnp.float32)

    return dict(
        w_q=conv_w(ks[0], in_dim, in_dim, 3, 3),
        b_q=0.01 * jax.random.normal(ks[1], (in_dim,), jnp.float32),
        w_ok=conv_w(ks[2], in_dim, in_dim, 3, 3),
        b_ok=0.01 * jax.random.normal(ks[3], (in_dim,), jnp.float32),
        w_rel=conv_w(ks[4], out_dim, in_dim, 3, 3),
        b_rel=0.01 * jax.random.normal(ks[5], (out_dim,), jnp.float32),
        w_v=conv_w(ks[6], 2 * out_dim, 2 * out_dim, 1, 1),
        b_v=0.01 * jax.random.normal(ks[7], (2 * out_dim,), jnp.float32),
        # PyTorch inits these to 0 (which would zero the attention branches);
        # use deterministic nonzero values so the attention path is exercised.
        gamma_spatial=jnp.float32(0.5),
        gamma_channel=jnp.float32(0.25),
    )


# ---------------------------------------------------------------------------
# Pure-JAX f32 reference (for correctness check)
# ---------------------------------------------------------------------------
def _conv_ref(x, w, b):
    out = jax.lax.conv_general_dilated(
        x, w, window_strides=(1, 1), padding=((2, 2), (2, 2)),
        rhs_dilation=(2, 2), dimension_numbers=("NCHW", "OIHW", "NCHW"),
        precision=jax.lax.Precision.HIGHEST)
    return out + b[None, :, None, None]


def ref_forward(x, y, params):
    B, C, H, W = x.shape
    Co = params["w_rel"].shape[0]
    N = H * W
    hp = jax.lax.Precision.HIGHEST
    q = _conv_ref(x, params["w_q"], params["b_q"]).reshape(B, C, N)
    ok = _conv_ref(x, params["w_ok"], params["b_ok"]).reshape(B, C, N)
    rk = _conv_ref(x, params["w_rel"], params["b_rel"]).reshape(B, Co, N)
    sm = jax.nn.softmax(jnp.einsum("bci,bcj->bij", q, ok, precision=hp), axis=-1)
    S = jnp.swapaxes(sm, 1, 2)
    ca = jax.nn.softmax(jnp.einsum("bpn,bcn->bpc", rk, q, precision=hp), axis=-1)
    yv = y.reshape(B, 2 * Co, N)
    out_sp = jnp.einsum("bpn,bnm->bpm", yv, S, precision=hp)
    out_ch = jnp.einsum("bpc,bcn->bpn", ca, x.reshape(B, C, N), precision=hp)
    out_ch = jnp.repeat(out_ch, 2, axis=1)
    pre = (params["gamma_spatial"] * out_sp + yv
           + params["gamma_channel"] * out_ch)
    wv = params["w_v"].reshape(2 * Co, 2 * Co)
    out = (jnp.einsum("pq,bqn->bpn", wv, pre, precision=hp)
           + params["b_v"][None, :, None])
    return out.reshape(B, 2 * Co, H, W)


if __name__ == "__main__":
    key = jax.random.PRNGKey(0)
    kx, ky_, kp = jax.random.split(key, 3)
    B, in_dim, out_dim, H, W = 2, 4, 4, 16, 16
    x = jax.random.normal(kx, (B, in_dim, H, W), jnp.float32)
    y = jax.random.normal(ky_, (B, 2 * out_dim, H, W), jnp.float32)
    params = init_params(kp, in_dim, out_dim)

    # Probe pipeline_mode=pl.Buffered(1) support eagerly (outside jit tracing).
    _buffered_one()

    # tq/tn = 128 so the test exercises the multi-tile (N//TQ = 2) path.
    fwd = jax.jit(functools.partial(da_module_forward, tq=128, tn=128))
    out = jax.block_until_ready(fwd(x, y, params))
    ref = ref_forward(x, y, params)

    assert out.shape == (B, 2 * out_dim, H, W)
    err = float(jnp.max(jnp.abs(out - ref)))
    # bf16 MXU operands + bf16 HBM storage of q/ok/y -> slightly looser than f32.
    assert err < 2e-2, f"max abs err {err}"
    print("KERNEL_OK")
</pallas_src>

<mosaic_0001>
module attributes {stable_mosaic.version = 11 : i64} {
  func.func @_probe(%arg0: i32, %arg1: i32, %arg2: memref<1x8x128xbf16, #tpu.memory_space<vmem>>, %arg3: memref<1x8x128xf32, #tpu.memory_space<vmem>>, %arg4: memref<1x8x128xf32, #tpu.memory_space<vmem>>) attributes {dimension_semantics = [#tpu.dimension_semantics<parallel>, #tpu.dimension_semantics<parallel>], iteration_bounds = array<i64: 2, 2>, scalar_prefetch = 0 : i64, scratch_operands = 0 : i64, tpu.core_type = #tpu.core_type<tc>, window_params = [{pipeline_mode = #tpu.pipeline_mode<synchronous>, transform_indices = @transform_0, window_bounds = array<i64: 1, 8, 128>}, {transform_indices = @transform_1, window_bounds = array<i64: 1, 8, 128>}, {transform_indices = @transform_2, window_bounds = array<i64: 1, 8, 128>}]} {
    %c0 = arith.constant 0 : index
    %c0_0 = arith.constant 0 : index
    %c0_1 = arith.constant 0 : index
    %0 = vector.load %arg2[%c0, %c0_0, %c0_1] : memref<1x8x128xbf16, #tpu.memory_space<vmem>>, vector<1x8x128xbf16>
    %1 = vector.shape_cast %0 : vector<1x8x128xbf16> to vector<8x128xbf16>
    %2 = arith.extf %1 : vector<8x128xbf16> to vector<8x128xf32>
    %c0_2 = arith.constant 0 : index
    %c0_3 = arith.constant 0 : index
    %c0_4 = arith.constant 0 : index
    %3 = vector.load %arg3[%c0_2, %c0_3, %c0_4] : memref<1x8x128xf32, #tpu.memory_space<vmem>>, vector<1x8x128xf32>
    %4 = vector.shape_cast %3 : vector<1x8x128xf32> to vector<8x128xf32>
    %5 = arith.addf %2, %4 : vector<8x128xf32>
    %c0_5 = arith.constant 0 : index
    %c0_6 = arith.constant 0 : index
    %c0_7 = arith.constant 0 : index
    %6 = vector.load %arg4[%c0_5, %c0_6, %c0_7] : memref<1x8x128xf32, #tpu.memory_space<vmem>>, vector<1x8x128xf32>
    %7 = vector.shape_cast %6 : vector<1x8x128xf32> to vector<8x128xf32>
    %8 = vector.shape_cast %5 : vector<8x128xf32> to vector<1x8x128xf32>
    tpu.vector_store %arg4[%c0_5, %c0_6, %c0_7], %8 {strides = array<i32>} : memref<1x8x128xf32, #tpu.memory_space<vmem>>, vector<1x8x128xf32>,
    return
  }
  func.func @transform_0(%arg0: i32, %arg1: i32) -> (i32, i32, i32) {
    %c0_i32 = arith.constant 0 : i32
    %c0_i32_0 = arith.constant 0 : i32
    %c0_i32_1 = arith.constant 0 : i32
    return %arg0, %c0_i32, %c0_i32_0 : i32, i32, i32
  }
  func.func @transform_1(%arg0: i32, %arg1: i32) -> (i32, i32, i32) {
    %c0_i32 = arith.constant 0 : i32
    %c0_i32_0 = arith.constant 0 : i32
    return %arg0, %c0_i32, %arg1 : i32, i32, i32
  }
  func.func @transform_2(%arg0: i32, %arg1: i32) -> (i32, i32, i32) {
    %c0_i32 = arith.constant 0 : i32
    %c0_i32_0 = arith.constant 0 : i32
    return %arg0, %c0_i32, %arg1 : i32, i32, i32
  }
}

module attributes {stable_mosaic.version = 11 : i64} {
  func.func @_conv_matmul_kernel(%arg0: i32, %arg1: i32, %arg2: memref<12x36xbf16, #tpu.memory_space<vmem>>, %arg3: memref<12x1xf32, #tpu.memory_space<vmem>>, %arg4: memref<1x36x128xbf16, #tpu.memory_space<vmem>>, %arg5: memref<1x12x128xbf16, #tpu.memory_space<vmem>>) attributes {dimension_semantics = [#tpu.dimension_semantics<parallel>, #tpu.dimension_semantics<parallel>], iteration_bounds = array<i64: 2, 2>, scalar_prefetch = 0 : i64, scratch_operands = 0 : i64, tpu.core_type = #tpu.core_type<tc>, window_params = [{pipeline_mode = #tpu.pipeline_mode<synchronous>, transform_indices = @transform_0, window_bounds = array<i64: 12, 36>}, {pipeline_mode = #tpu.pipeline_mode<synchronous>, transform_indices = @transform_1, window_bounds = array<i64: 12, 1>}, {transform_indices = @transform_2, window_bounds = array<i64: 1, 36, 128>}, {transform_indices = @transform_3, window_bounds = array<i64: 1, 12, 128>}]} {
    %c0 = arith.constant 0 : index
    %c0_0 = arith.constant 0 : index
    %0 = vector.load %arg2[%c0, %c0_0] : memref<12x36xbf16, #tpu.memory_space<vmem>>, vector<12x36xbf16>
    %c0_1 = arith.constant 0 : index
    %c0_2 = arith.constant 0 : index
    %c0_3 = arith.constant 0 : index
    %1 = vector.load %arg4[%c0_1, %c0_2, %c0_3] : memref<1x36x128xbf16, #tpu.memory_space<vmem>>, vector<1x36x128xbf16>
    %2 = vector.shape_cast %1 : vector<1x36x128xbf16> to vector<36x128xbf16>
    %cst = arith.constant dense<0.000000e+00> : vector<12x128xf32>
    %3 = tpu.matmul %0, %2, %cst {dimension_numbers = #tpu.dot_dimension_numbers<[1], [0], [0], [1], [0, 0, 1, 1], [], []>} : vector<12x36xbf16>, vector<36x128xbf16>, vector<12x128xf32> -> vector<12x128xf32>
    %c0_4 = arith.constant 0 : index
    %c0_5 = arith.constant 0 : index
    %4 = vector.load %arg3[%c0_4, %c0_5] : memref<12x1xf32, #tpu.memory_space<vmem>>, vector<12x1xf32>
    %5 = vector.broadcast %4 : vector<12x1xf32> to vector<12x128xf32>
    %6 = arith.addf %3, %5 : vector<12x128xf32>
    %7 = arith.truncf %6 : vector<12x128xf32> to vector<12x128xbf16>
    %c0_6 = arith.constant 0 : index
    %c0_7 = arith.constant 0 : index
    %c0_8 = arith.constant 0 : index
    %8 = vector.load %arg5[%c0_6, %c0_7, %c0_8] : memref<1x12x128xbf16, #tpu.memory_space<vmem>>, vector<1x12x128xbf16>
    %9 = vector.shape_cast %8 : vector<1x12x128xbf16> to vector<12x128xbf16>
    %10 = vector.shape_cast %7 : vector<12x128xbf16> to vector<1x12x128xbf16>
    tpu.vector_store %arg5[%c0_6, %c0_7, %c0_8], %10 {strides = array<i32>} : memref<1x12x128xbf16, #tpu.memory_space<vmem>>, vector<1x12x128xbf16>,
    return
  }
  func.func @transform_0(%arg0: i32, %arg1: i32) -> (i32, i32) {
    %c0_i32 = arith.constant 0 : i32
    %c0_i32_0 = arith.constant 0 : i32
    %c0_i32_1 = arith.constant 0 : i32
    return %c0_i32, %c0_i32_0 : i32, i32
  }
  func.func @transform_1(%arg0: i32, %arg1: i32) -> (i32, i32) {
    %c0_i32 = arith.constant 0 : i32
    %c0_i32_0 = arith.constant 0 : i32
    %c0_i32_1 = arith.constant 0 : i32
    return %c0_i32, %c0_i32_0 : i32, i32
  }
  func.func @transform_2(%arg0: i32, %arg1: i32) -> (i32, i32, i32) {
    %c0_i32 = arith.constant 0 : i32
    %c0_i32_0 = arith.constant 0 : i32
    return %arg0, %c0_i32, %arg1 : i32, i32, i32
  }
  func.func @transform_3(%arg0: i32, %arg1: i32) -> (i32, i32, i32) {
    %c0_i32 = arith.constant 0 : i32
    %c0_i32_0 = arith.constant 0 : i32
    return %arg0, %c0_i32, %arg1 : i32, i32, i32
  }
}

module attributes {stable_mosaic.version = 11 : i64} {
  func.func @_da_attention_kernel(%arg0: i32, %arg1: i32, %arg2: memref<1xf32, #tpu.memory_space<smem>>, %arg3: memref<1x256xf32, #tpu.memory_space<vmem>>, %arg4: memref<1x4x128xbf16, #tpu.memory_space<vmem>>, %arg5: memref<1x4x256xbf16, #tpu.memory_space<vmem>>, %arg6: memref<1x4x128xf32, #tpu.memory_space<vmem>>, %arg7: memref<1x8x256xbf16, #tpu.memory_space<vmem>>, %arg8: memref<8x8xf32, #tpu.memory_space<vmem>>, %arg9: memref<1x8x4xf32, #tpu.memory_space<vmem>>, %arg10: memref<8x1xf32, #tpu.memory_space<vmem>>, %arg11: memref<1x8x128xf32, #tpu.memory_space<vmem>>) attributes {dimension_semantics = [#tpu.dimension_semantics<parallel>, #tpu.dimension_semantics<parallel>], iteration_bounds = array<i64: 2, 2>, scalar_prefetch = 0 : i64, scratch_operands = 0 : i64, tpu.core_type = #tpu.core_type<tc>, window_params = [{transform_indices = @transform_0, window_bounds = array<i64: 1>}, {pipeline_mode = #tpu.pipeline_mode<synchronous>, transform_indices = @transform_1, window_bounds = array<i64: 1, 256>}, {transform_indices = @transform_2, window_bounds = array<i64: 1, 4, 128>}, {transform_indices = @transform_3, window_bounds = array<i64: 1, 4, 256>}, {transform_indices = @transform_4, window_bounds = array<i64: 1, 4, 128>}, {transform_indices = @transform_5, window_bounds = array<i64: 1, 8, 256>}, {pipeline_mode = #tpu.pipeline_mode<synchronous>, transform_indices = @transform_6, window_bounds = array<i64: 8, 8>}, {transform_indices = @transform_7, window_bounds = array<i64: 1, 8, 4>}, {pipeline_mode = #tpu.pipeline_mode<synchronous>, transform_indices = @transform_8, window_bounds = array<i64: 8, 1>}, {transform_indices = @transform_9, window_bounds = array<i64: 1, 8, 128>}]} {
    %c0 = arith.constant 0 : index
    %c0_0 = arith.constant 0 : index
    %c0_1 = arith.constant 0 : index
    %0 = vector.load %arg4[%c0, %c0_0, %c0_1] : memref<1x4x128xbf16, #tpu.memory_space<vmem>>, vector<1x4x128xbf16>
    %1 = vector.shape_cast %0 : vector<1x4x128xbf16> to vector<4x128xbf16>
    %c0_2 = arith.constant 0 : index
    %c0_3 = arith.constant 0 : index
    %c0_4 = arith.constant 0 : index
    %2 = vector.load %arg5[%c0_2, %c0_3, %c0_4] : memref<1x4x256xbf16, #tpu.memory_space<vmem>>, vector<1x4x256xbf16>
    %3 = vector.shape_cast %2 : vector<1x4x256xbf16> to vector<4x256xbf16>
    %cst = arith.constant dense<0.000000e+00> : vector<128x256xf32>
    %4 = tpu.matmul %1, %3, %cst {dimension_numbers = #tpu.dot_dimension_numbers<[0], [0], [1], [1], [0, 1, 1, 1], [], []>} : vector<4x128xbf16>, vector<4x256xbf16>, vector<128x256xf32> -> vector<128x256xf32>
    %c0_5 = arith.constant 0 : index
    %c0_6 = arith.constant 0 : index
    %5 = vector.load %arg3[%c0_5, %c0_6] : memref<1x256xf32, #tpu.memory_space<vmem>>, vector<1x256xf32>
    %6 = vector.broadcast %5 : vector<1x256xf32> to vector<128x256xf32>
    %7 = arith.addf %4, %6 : vector<128x256xf32>
    %cst_7 = arith.constant dense<0xFF800000> : vector<128xf32>
    %8 = vector.multi_reduction <maximumf>, %7, %cst_7 [1] : vector<128x256xf32> to vector<128xf32>
    %9 = vector.shape_cast %8 : vector<128xf32> to vector<128x1xf32>
    %10 = vector.broadcast %9 : vector<128x1xf32> to vector<128x256xf32>
    %11 = arith.subf %7, %10 : vector<128x256xf32>
    %12 = math.exp %11 : vector<128x256xf32>
    %cst_8 = arith.constant dense<0.000000e+00> : vector<128xf32>
    %13 = vector.multi_reduction <add>, %12, %cst_8 [1] : vector<128x256xf32> to vector<128xf32>
    %14 = vector.shape_cast %13 : vector<128xf32> to vector<128x1xf32>
    %15 = tpu.reciprocal %14 {approx = true} : vector<128x1xf32> -> vector<128x1xf32>
    %16 = vector.broadcast %15 : vector<128x1xf32> to vector<128x256xf32>
    %17 = arith.mulf %12, %16 : vector<128x256xf32>
    %18 = arith.truncf %17 : vector<128x256xf32> to vector<128x256xbf16>
    %c0_9 = arith.constant 0 : index
    %c0_10 = arith.constant 0 : index
    %c0_11 = arith.constant 0 : index
    %19 = vector.load %arg7[%c0_9, %c0_10, %c0_11] : memref<1x8x256xbf16, #tpu.memory_space<vmem>>, vector<1x8x256xbf16>
    %20 = vector.shape_cast %19 : vector<1x8x256xbf16> to vector<8x256xbf16>
    %cst_12 = arith.constant dense<0.000000e+00> : vector<8x128xf32>
    %21 = tpu.matmul %20, %18, %cst_12 {dimension_numbers = #tpu.dot_dimension_numbers<[1], [1], [0], [0], [0, 0, 1, 0], [], []>} : vector<8x256xbf16>, vector<128x256xbf16>, vector<8x128xf32> -> vector<8x128xf32>
    %c128_i32 = arith.constant 128 : i32
    %22 = arith.muli %arg1, %c128_i32 : i32
    %23 = tpu.assume_multiple %22, 128 : i32
    %c0_13 = arith.constant 0 : index
    %c0_14 = arith.constant 0 : index
    %24 = arith.index_cast %23 : i32 to index
    %25 = vector.load %arg7[%c0_13, %c0_14, %24] : memref<1x8x256xbf16, #tpu.memory_space<vmem>>, vector<1x8x128xbf16>
    %26 = vector.shape_cast %25 : vector<1x8x128xbf16> to vector<8x128xbf16>
    %27 = arith.extf %26 : vector<8x128xbf16> to vector<8x128xf32>
    %c0_15 = arith.constant 0 : index
    %28 = memref.load %arg2[%c0_15] : memref<1xf32, #tpu.memory_space<smem>>
    %29 = vector.broadcast %28 : f32 to vector<8x128xf32>
    %30 = arith.mulf %29, %21 : vector<8x128xf32>
    %31 = arith.addf %30, %27 : vector<8x128xf32>
    %c0_16 = arith.constant 0 : index
    %c0_17 = arith.constant 0 : index
    %32 = vector.load %arg8[%c0_16, %c0_17] : memref<8x8xf32, #tpu.memory_space<vmem>>, vector<8x8xf32>
    %cst_18 = arith.constant dense<0.000000e+00> : vector<8x128xf32>
    %33 = tpu.matmul %32, %31, %cst_18 {dimension_numbers = #tpu.dot_dimension_numbers<[1], [0], [0], [1], [0, 0, 1, 1], [], []>} : vector<8x8xf32>, vector<8x128xf32>, vector<8x128xf32> -> vector<8x128xf32>
    %c0_19 = arith.constant 0 : index
    %c0_20 = arith.constant 0 : index
    %c0_21 = arith.constant 0 : index
    %34 = vector.load %arg9[%c0_19, %c0_20, %c0_21] : memref<1x8x4xf32, #tpu.memory_space<vmem>>, vector<1x8x4xf32>
    %35 = vector.shape_cast %34 : vector<1x8x4xf32> to vector<8x4xf32>
    %c0_22 = arith.constant 0 : index
    %c0_23 = arith.constant 0 : index
    %c0_24 = arith.constant 0 : index
    %36 = vector.load %arg6[%c0_22, %c0_23, %c0_24] : memref<1x4x128xf32, #tpu.memory_space<vmem>>, vector<1x4x128xf32>
    %37 = vector.shape_cast %36 : vector<1x4x128xf32> to vector<4x128xf32>
    %cst_25 = arith.constant dense<0.000000e+00> : vector<8x128xf32>
    %38 = tpu.matmul %35, %37, %cst_25 {dimension_numbers = #tpu.dot_dimension_numbers<[1], [0], [0], [1], [0, 0, 1, 1], [], []>} : vector<8x4xf32>, vector<4x128xf32>, vector<8x128xf32> -> vector<8x128xf32>
    %39 = arith.addf %33, %38 : vector<8x128xf32>
    %c0_26 = arith.constant 0 : index
    %c0_27 = arith.constant 0 : index
    %40 = vector.load %arg10[%c0_26, %c0_27] : memref<8x1xf32, #tpu.memory_space<vmem>>, vector<8x1xf32>
    %41 = vector.broadcast %40 : vector<8x1xf32> to vector<8x128xf32>
    %42 = arith.addf %39, %41 : vector<8x128xf32>
    %c0_28 = arith.constant 0 : index
    %c0_29 = arith.constant 0 : index
    %c0_30 = arith.constant 0 : index
    %43 = vector.load %arg11[%c0_28, %c0_29, %c0_30] : memref<1x8x128xf32, #tpu.memory_space<vmem>>, vector<1x8x128xf32>
    %44 = vector.shape_cast %43 : vector<1x8x128xf32> to vector<8x128xf32>
    %45 = vector.shape_cast %42 : vector<8x128xf32> to vector<1x8x128xf32>
    tpu.vector_store %arg11[%c0_28, %c0_29, %c0_30], %45 {strides = array<i32>} : memref<1x8x128xf32, #tpu.memory_space<vmem>>, vector<1x8x128xf32>,
    return
  }
  func.func @transform_0(%arg0: i32, %arg1: i32) -> i32 {
    %c0_i32 = arith.constant 0 : i32
    %c0_i32_0 = arith.constant 0 : i32
    return %c0_i32 : i32
  }
  func.func @transform_1(%arg0: i32, %arg1: i32) -> (i32, i32) {
    %c0_i32 = arith.constant 0 : i32
    %c0_i32_0 = arith.constant 0 : i32
    %c0_i32_1 = arith.constant 0 : i32
    return %c0_i32, %c0_i32_0 : i32, i32
  }
  func.func @transform_2(%arg0: i32, %arg1: i32) -> (i32, i32, i32) {
    %c0_i32 = arith.constant 0 : i32
    %c0_i32_0 = arith.constant 0 : i32
    return %arg0, %c0_i32, %arg1 : i32, i32, i32
  }
  func.func @transform_3(%arg0: i32, %arg1: i32) -> (i32, i32, i32) {
    %c0_i32 = arith.constant 0 : i32
    %c0_i32_0 = arith.constant 0 : i32
    %c0_i32_1 = arith.constant 0 : i32
    return %arg0, %c0_i32, %c0_i32_0 : i32, i32, i32
  }
  func.func @transform_4(%arg0: i32, %arg1: i32) -> (i32, i32, i32) {
    %c0_i32 = arith.constant 0 : i32
    %c0_i32_0 = arith.constant 0 : i32
    return %arg0, %c0_i32, %arg1 : i32, i32, i32
  }
  func.func @transform_5(%arg0: i32, %arg1: i32) -> (i32, i32, i32) {
    %c0_i32 = arith.constant 0 : i32
    %c0_i32_0 = arith.constant 0 : i32
    %c0_i32_1 = arith.constant 0 : i32
    return %arg0, %c0_i32, %c0_i32_0 : i32, i32, i32
  }
  func.func @transform_6(%arg0: i32, %arg1: i32) -> (i32, i32) {
    %c0_i32 = arith.constant 0 : i32
    %c0_i32_0 = arith.constant 0 : i32
    %c0_i32_1 = arith.constant 0 : i32
    return %c0_i32, %c0_i32_0 : i32, i32
  }
  func.func @transform_7(%arg0: i32, %arg1: i32) -> (i32, i32, i32) {
    %c0_i32 = arith.constant 0 : i32
    %c0_i32_0 = arith.constant 0 : i32
    %c0_i32_1 = arith.constant 0 : i32
    return %arg0, %c0_i32, %c0_i32_0 : i32, i32, i32
  }
  func.func @transform_8(%arg0: i32, %arg1: i32) -> (i32, i32) {
    %c0_i32 = arith.constant 0 : i32
    %c0_i32_0 = arith.constant 0 : i32
    %c0_i32_1 = arith.constant 0 : i32
    return %c0_i32, %c0_i32_0 : i32, i32
  }
  func.func @transform_9(%arg0: i32, %arg1: i32) -> (i32, i32, i32) {
    %c0_i32 = arith.constant 0 : i32
    %c0_i32_0 = arith.constant 0 : i32
    return %arg0, %c0_i32, %arg1 : i32, i32, i32
  }
}

</mosaic_0001>

<bundles_post_ra>
// kernel: tpu_custom_call.1
= control target key start
LH: loop header
LB: loop body
LE: loop exit
PB: predicated region body
PF: predicated region fallthrough
CT: control target
= control target key end

     0   :  { %s913_s0 = inlined_call_operand.hbm [shape: bf16[2,8,128], index: 0, kind: input, shape index: {}]   ;;  %s914_s1 = inlined_call_operand.hbm [shape: f32[2,8,256], index: 1, kind: input, shape index: {}]   ;;  %s915_s2 = inlined_call_operand.hbm [shape: f32[2,8,256], index: 2, kind: output, shape index: {}]  }
   0x1   :  { %927 = sst [smem:[#allocation16_spill]] %s913_s0 }
   0x2   :  { %928 = sst [smem:[#allocation17_spill]] %s915_s2 }
   0x3   :  { %7 = vsyncpa [#allocation3], 0 }
   0x4   :  { %8 = vsyncpa [#allocation6], 0 }
   0x5   :  { %10 = vsyncpa [#allocation6 + $0x1], 0 }
   0x6   :  { %11 = vsyncpa [#allocation4], 0 }
   0x7   :  { %13 = vsyncpa [#allocation4 + $0x1], 0  ;;  %s648_s9 = smov 0   ;;  %s650_s10 = smov 0  }
   0x8   :  { %s652_s11 = smov 0   ;;  %s654_s12 = smov 0  }
   0x9   :  { %s656_s13 = smov 0   ;;  %s658_s14 = smov 0  }
   0xa   :  { %s660_s15 = smov 0   ;;  %s662_s16 = smov 0  }
   0xb   :  { %s664_s17 = smov 0   ;;  %s666_s18 = smov 0  }
   0xc   :  { %s668_s19 = smov 0  }
   0xd LB: > { %929 = sst [smem:[#allocation11_spill]] %s588_s9  ;;  %s317_s20 = sadd.s32 4294967295, %s628_s19   ;;  %s628_s19 = sphi %s668_s19, %s19_s19   ;;  %s624_s18 = sphi %s666_s18, %s961_s18   ;;  %s620_s17 = sphi %s664_s17, %s960_s17   ;;  %s616_s16 = sphi %s662_s16, %s959_s16   ;;  %s612_s15 = sphi %s660_s15, %s958_s15   ;;  %s608_s14 = sphi %s658_s14, %s957_s14   ;;  %s604_s13 = sphi %s656_s13, %s956_s13   ;;  %s600_s12 = sphi %s654_s12, %s951_s12   ;;  %s596_s11 = sphi %s652_s11, %s955_s11   ;;  %s592_s10 = sphi %s650_s10, %s954_s10   ;;  %s588_s9 = sphi %s648_s9, %s953_s9  }
   0xe   : > { %930 = sst [smem:[#allocation12_spill]] %s604_s13  ;;  %s318_s21 = sadd.s32 4294967294, %s628_s19  }
   0xf   : > { %p51_p0 = scmp.ne.s32.totalorder %s604_s13, %s600_s12  ;;  %p52_p1 = scmp.eq.s32.totalorder %s317_s20, 0 }
  0x10   : > { %p79_p2 = scmp.ne.s32.totalorder %s592_s10, %s588_s9  ;;  %p111_p4 = scmp.eq.s32.totalorder %s318_s21, 3 }
  0x11   : > { %p708_p3 = por %p52_p1, %p51_p0  ;;  %p319_p6 = scmp.ge.s32.totalorder %s628_s19, 1 }
  0x12   : > { %p712_p5 = por %p79_p2, %p52_p1  ;;  %p717_p7 = por %p111_p4, %p79_p2 }
  0x13   : > { %s931_s22 = scalar_select %p708_p3, 1, 0 }
  0x14   : > { %s932_s23 = scalar_select %p712_p5, 1, 0 }
  0x15   : > { %s933_s24 = scalar_select %p717_p7, 1, 0 }
  0x16   : > { %p118_p8 = scmp.lt.s32.totalorder %s628_s19, 5  ;;  %s320_s25 = sshll.u32 %s616_s16, 6 }
  0x17   : > { %934 = sst [smem:[#allocation13_spill]] %s933_s24  ;;  %s936_s0 = sld [smem:[#allocation16_spill]] }
  0x18   : > { %p723_p9 = pnand %p319_p6, %p118_p8  ;;  %s630_s30 = smov [#allocation2]  }
  0x19   : > { %s133_s3 = sshll.u32 %s630_s30, 4  ;;  %s134_s3 = int_to_ptr.vmem [resolvable:$true] %s133_s3 }
  0x1a   : > { %s935_s26 = scalar_select %p723_p9, 1, 0 }
  0x1b   : > { %p339_p10 = pneg %p723_p9 }
  0x1d   : > { %s131_s29 = scalar_lea.hbm %s936_s0, %s320_s25  ;;  %p734_p11 = pnand %p339_p10, %p708_p3 }
  0x1e   : > { %s442_s5 = scalar_lea.hbm %s131_s29, 64  ;;  %s447_s8 = scalar_lea.hbm %s936_s0, 128 }
  0x1f   : > { %p443_p12 = scmp.ne.s32.totalorder %s131_s29, %s442_s5  ;;  %p444_p13 = pneg %p734_p11 }
  0x20   : > { %p448_p2 = scmp.lt.u32.totalorder %s131_s29, %s936_s0  ;;  %p449_p4 = scmp.lt.u32.totalorder %s447_s8, %s442_s5 }
  0x21   : > { %p445_p0 = pnand %p444_p13, %p443_p12  ;;  %p451_p8 = scmp.lt.u32.totalorder %s442_s5, %s131_s29 }
  0x22   : > { %p450_p6 = por %p449_p4, %p448_p2 }
  0x23   : > { %p446_p1 = pneg %p445_p0 }
  0x24   : > { %p452_p10 = por %p451_p8, %p450_p6 }
  0x26   : > { %p453_p7 = pnand %p452_p10, %p446_p1 }
  0x28   : > { %456 = shalt.err (!%p453_p7)
}
  0x29   : > { %s457_s25 = scalar_lea.vmem %s134_s3, 64  ;;  %p465_p3 = scmp.lt.s32.totalorder %s134_s3, %s134_s3 }
  0x2a   : > { %p458_p5 = scmp.ne.s32.totalorder %s134_s3, %s457_s25  ;;  %p466_p9 = scmp.lt.s32.totalorder %s457_s25, %s457_s25 }
  0x2c   : > { %p460_p12 = pnand %p458_p5, %p444_p13  ;;  %p467_p2 = por %p466_p9, %p465_p3 }
  0x2e   : > { %p461_p0 = pneg %p460_p12 }
  0x30   : > { %p468_p4 = pnand %p467_p2, %p461_p0 }
  0x32   : > { %471 = shalt.err (!%p468_p4)
}
  0x33   : > { %342 = dma.hbm_to_vmem [thread:$0]  (!%p734_p11), %s131_s29, 64, %s134_s3, [#allocation3]  }
  0x34   : > { %p105_p5 = scmp.eq.s32.totalorder %s317_s20, 3  ;;  %s28_s27 = sadd.s32 1, %s620_s17 }
  0x35   : > { %p29_p3 = scmp.ge.s32.totalorder %s28_s27, 2  ;;  %s31_s28 = sadd.s32 1, %s624_s18 }
  0x36   : > { %s38_s30 = sadd.s32 1, %s608_s14  ;;  %p73_p7 = scmp.ne.s32.totalorder %s596_s11, %s592_s10 }
  0x37   : > { %s963_s27 = smov (%p29_p3, %s28_s27), 0  ;;  %s965_s28 = smov (!%p29_p3, %s31_s28), %s624_s18 }
  0x38   : > { %938 = sst [smem:[#allocation14_spill]] %s963_s27  ;;  %s66_s4 = sadd.s32 1, %s596_s11 }
  0x39   : > { %p74_p9 = scmp.eq.s32.totalorder %s628_s19, 0  ;;  %p33_p11 = scmp.ge.s32.totalorder %s965_s28, 2 }
  0x3a   : > { %p766_p13 = por %p105_p5, %p73_p7  ;;  %s62_s29 = ssub.s32 %s620_s17, %s963_s27 }
  0x3b   : > { %p772_p1 = por %p74_p9, %p73_p7  ;;  %s967_s28 = smov (%p33_p11, %s965_s28), 0 }
  0x3c   : > { %s939_s20 = scalar_select %p766_p13, 1, 0 }
  0x3d   : > { %p351_p6 = scmp.lt.s32.totalorder %s628_s19, 4  ;;  %s144_s5 = sand.u32 1, %s596_s11  }
  0x3e   : > { %940 = sst [smem:[#allocation15_spill]] %s939_s20  ;;  %s35_s6 = ssub.s32 %s624_s18, %s967_s28 }
  0x3f   : > { %s323_s7 = sshll.u32 %s624_s18, 1  ;;  %p36_p8 = scmp.eq.s32.totalorder %s35_s6, 0 }
  0x40   : > { %s63_s8 = sor.u32 %s62_s29, %s35_s6  ;;  %s322_s12 = sshll.u32 %s144_s5, 3 }
  0x41   : > { %p64_p10 = scmp.eq.s32.totalorder %s63_s8, 0  ;;  %s153_s0 = sadd.s32 %s620_s17, %s323_s7 }
  0x42   : > { %s784_s21 = scalar_select %p36_p8, %s608_s14, %s38_s30  }
  0x43   : > { %s787_s25 = scalar_select %p64_p10, %s596_s11, %s66_s4  }
  0x44   : > { %s324_s27 = sshll.u32 %s153_s0, 7  ;;  %s148_s13 = scalar_lea.vmem [#allocation5], %s322_s12 }
  0x45   : > { %s157_s24 = sshll.u32 %s148_s13, 4  ;;  %s793_s20 = scalar_lea.hbm %s914_s1, %s324_s27  ;;  %s795_s24 = int_to_ptr.vmem [resolvable:$true] %s157_s24 }
  0x46   : > { %p801_p12 = pnand %p351_p6, %p772_p1  ;;  %s145_s0 = scalar_lea.sflag [#allocation6], %s144_s5 }
  0x47   : > { %s472_s13 = scalar_lea.hbm %s793_s20, 128  ;;  %s477_s27 = scalar_lea.hbm %s914_s1, 512 }
  0x48   : > { %p473_p0 = scmp.ne.s32.totalorder %s793_s20, %s472_s13  ;;  %p474_p2 = pneg %p801_p12 }
  0x49   : > { %p478_p3 = scmp.lt.u32.totalorder %s793_s20, %s914_s1  ;;  %p479_p7 = scmp.lt.u32.totalorder %s477_s27, %s472_s13 }
  0x4a   : > { %p475_p4 = pnand %p474_p2, %p473_p0  ;;  %p481_p11 = scmp.lt.u32.totalorder %s472_s13, %s793_s20 }
  0x4b   : > { %p480_p9 = por %p479_p7, %p478_p3 }
  0x4c   : > { %p476_p5 = pneg %p475_p4 }
  0x4d   : > { %p482_p1 = por %p481_p11, %p480_p9 }
  0x4f   : > { %p483_p6 = pnand %p482_p1, %p476_p5 }
  0x51   : > { %486 = shalt.err (!%p483_p6)
}
  0x52   : > { %s487_s3 = scalar_lea.vmem %s795_s24, 128  ;;  %s631_s5 = smov [#allocation5]  }
  0x53   : > { %p488_p8 = scmp.ne.s32.totalorder %s795_s24, %s487_s3  ;;  %s492_s6 = sshll.u32 %s631_s5, 4  ;;  %s493_s6 = int_to_ptr.vmem [resolvable:$false] %s492_s6 }
  0x54   : > { %s494_s7 = scalar_lea.vmem %s493_s6, 256  ;;  %p495_p4 = scmp.lt.s32.totalorder %s795_s24, %s493_s6 }
  0x55   : > { %p490_p10 = pnand %p488_p8, %p474_p2  ;;  %p496_p3 = scmp.lt.s32.totalorder %s494_s7, %s487_s3 }
  0x57   : > { %p491_p0 = pneg %p490_p10  ;;  %p497_p7 = por %p496_p3, %p495_p4 }
  0x59   : > { %p498_p9 = pnand %p497_p7, %p491_p0 }
  0x5b   : > { %501 = shalt.err (!%p498_p9)
}
  0x5c   : > { %346 = dma.hbm_to_vmem [thread:$0]  (!%p801_p12), %s793_s20, 128, %s795_s24, %s145_s0  }
  0x5d   : > { %p943_p5 = scmp.ne.s32.totalorder %s935_s26, 0 }
  0x5e   : > { %p944_p2 = scmp.ne.s32.totalorder (!%p943_p5), %s931_s22, 0 }
  0x5f   : > { %166 = sbr.rel (%p943_p5) target bundleno = 133 (0x85), region = 28 }
  0x66   : > { %575 = dma.done.wait (%p944_p2), [#allocation3], 64  }
  0x67   : > { %577 = vsyncadd (%p944_p2), [#allocation3], 4294967232  ;;  %s837_s8 = sand.u32 1, %s592_s10   ;;  %p945_p11 = scmp.ne.s32.totalorder %s932_s23, 0 }
  0x68   : > { %s326_s12 = sshll.u32 %s837_s8, 3  ;;  %s173_s30 = scalar_lea.sflag [#allocation6], %s837_s8 }
  0x69   : > { %s176_s13 = scalar_lea.vmem [#allocation5], %s326_s12 }
  0x6a   : > { %579 = dma.done.wait (%p945_p11), %s173_s30, 128  }
  0x6b   : > { %581 = vsyncadd (%p945_p11), %s173_s30, 4294967168  ;;  %s329_s22 = sshll.u32 %s616_s16, 1  ;;  %v197_v0 = vld [vmem:[#allocation2] sm:$0xf]  ;;  %v199_v1 = vld [vmem:[%s176_s13] sm:$0xff]  ;;  %s196_s20 = scalar_lea.vmem [#allocation7], %s326_s12 }
  0x6c   : > { %s214_s26 = sadd.s32 %s612_s15, %s329_s22  ;;  %s218_s0 = sshll.u32 %s196_s20, 4  ;;  %v198_v2 = vunpack.c.l.bf16 %v197_v0  ;;  %s847_s0 = int_to_ptr.vmem [resolvable:$true] %s218_s0 }
  0x6d   : > { %s330_s2 = sshll.u32 %s214_s26, 7  ;;  %s947_s4 = sld [smem:[#allocation17_spill]] }
  0x6e   : > { %v200_v3 = vadd.f32 %v199_v1, %v198_v2  ;;  %s203_s16 = scalar_lea.sflag [#allocation4], %s837_s8  ;;  %s502_s15 = scalar_lea.vmem %s847_s0, 128 }
  0x6f   : > { %p503_p12 = scmp.ne.s32.totalorder %s847_s0, %s502_s15  ;;  %s632_s29 = smov [#allocation7]  }
  0x70   : > { %201 = vst [vmem:[%s196_s20] sm:$0xff] %v200_v3  ;;  %s506_s3 = sshll.u32 %s632_s29, 4  ;;  %s507_s3 = int_to_ptr.vmem [resolvable:$false] %s506_s3 }
  0x71   : > { %p504_p1 = pnand %p503_p12, %p766_p13  ;;  %s508_s5 = scalar_lea.vmem %s507_s3, 256 }
  0x72   : > { %p509_p8 = scmp.lt.s32.totalorder %s847_s0, %s507_s3  ;;  %p510_p10 = scmp.lt.s32.totalorder %s508_s5, %s502_s15 }
  0x73   : > { %s852_s23 = scalar_lea.hbm %s947_s4, %s330_s2  ;;  %p505_p6 = pneg %p504_p1 }
  0x74   : > { %p511_p0 = por %p510_p10, %p509_p8 }
  0x76   : > { %p512_p4 = pnand %p511_p0, %p505_p6 }
  0x78   : > { %515 = shalt.err (!%p512_p4)
}
  0x79   : > { %s516_s6 = scalar_lea.hbm %s852_s23, 128  ;;  %s520_s12 = scalar_lea.hbm %s947_s4, 512 }
  0x7a   : > { %p517_p3 = scmp.ne.s32.totalorder %s852_s23, %s516_s6  ;;  %p521_p5 = scmp.lt.u32.totalorder %s852_s23, %s947_s4 }
  0x7b   : > { %p522_p2 = scmp.lt.u32.totalorder %s520_s12, %s516_s6  ;;  %p524_p12 = scmp.lt.u32.totalorder %s516_s6, %s852_s23 }
  0x7c   : > { %p518_p7 = pnand %p517_p3, %p766_p13 }
  0x7d   : > { %p523_p11 = por %p522_p2, %p521_p5 }
  0x7e   : > { %p519_p9 = pneg %p518_p7 }
  0x7f   : > { %p525_p1 = por %p524_p12, %p523_p11 }
  0x81   : > { %p526_p6 = pnand %p525_p1, %p519_p9 }
  0x83   : > { %529 = shalt.err (!%p526_p6)
}
  0x84   : > { %337 = dma.vmem_to_hbm [thread:$0]  (%p766_p13), %s847_s0, 128, %s852_s23, %s203_s16  }
  0x85 PF: > { %s948_s22 = sld [smem:[#allocation11_spill]]  ;;  %s949_s26 = sld [smem:[#allocation13_spill]] }
  0x86   : > { %p352_p8 = scmp.ge.s32.totalorder %s628_s19, 2 }
  0x8b   : > { %s230_s20 = sand.u32 1, %s948_s22   ;;  %p950_p10 = scmp.ne.s32.totalorder %s949_s26, 0 }
  0x8c   : > { %s231_s2 = scalar_lea.sflag [#allocation4], %s230_s20 }
  0x8d   : > { %p348_p0 = pnand %p352_p8, %p950_p10 }
  0x8f   : > { %583 = dma.done.wait (!%p348_p0), %s231_s2, 128  }
  0x90   : > { %585 = vsyncadd (!%p348_p0), %s231_s2, 4294967168  ;;  %s19_s19 = sadd.s32 1, %s628_s19   ;;  %s951_s12 = sld [smem:[#allocation12_spill]] }
  0x91   : > { %p16_p4 = scmp.ge.s32.totalorder %s19_s19, 6   ;;  %s952_s24 = sld [smem:[#allocation14_spill]] }
  0x92   : > { %s953_s9 = smov %s592_s10  ;;  %s954_s10 = smov %s596_s11 }
  0x93   : > { %s955_s11 = smov %s787_s25  ;;  %s956_s13 = smov %s608_s14 }
  0x94   : > { %s957_s14 = smov %s784_s21  ;;  %s958_s15 = smov %s620_s17 }
  0x95   : > { %s959_s16 = smov %s624_s18  ;;  %s961_s18 = smov %s967_s28 }
  0x96   :  { %18 = sbr.rel (!%p16_p4) target bundleno = 13 (0xd), region = 79 }
  0x97   : > { %s960_s17 = smov %s952_s24 }
  0x9d   :  { %236 = vsyncpa [#allocation3], 1 }
  0x9e   :  { %238 = vsyncpa [#allocation3 + $0x1], 1 }
  0x9f   :  { %239 = vsyncpa [#allocation6], 1 }
  0xa0   :  { %241 = vsyncpa [#allocation6 + $0x1], 1 }
  0xa1   :  { %242 = vsyncpa [#allocation4], 1 }
  0xa2   :  { %244 = vsyncpa [#allocation4 + $0x1], 1 }

// kernel: da_module_forward.2
= control target key start
LH: loop header
LB: loop body
LE: loop exit
PB: predicated region body
PF: predicated region fallthrough
CT: control target
= control target key end

     0   :  { %s646_s12 = smov 0   ;;  %s648_s13 = smov 0   ;;  %s751_s0 = inlined_call_operand.vmem [shape: bf16[12,36], index: 0, kind: input, shape index: {}]   ;;  %s752_s1 = inlined_call_operand.vmem [shape: f32[12,1], index: 1, kind: input, shape index: {}]   ;;  %s753_s2 = inlined_call_operand.vmem [shape: bf16[2,36,256], index: 2, kind: input, shape index: {}]   ;;  %s754_s3 = inlined_call_operand.vmem [shape: bf16[2,12,256], index: 3, kind: output, shape index: {}]  }
   0x1   :  { %s650_s14 = smov 0   ;;  %s652_s15 = smov 0  }
   0x2   :  { %s654_s16 = smov 0   ;;  %s656_s17 = smov 0  }
   0x3   :  { %s658_s18 = smov 0  }
   0x4 LB: > { %s22_s19 = sadd.s32 1, %s613_s16  ;;  %s25_s20 = sadd.s32 1, %s617_s17  ;;  %s621_s18 = sphi %s658_s18, %s13_s18   ;;  %s617_s17 = sphi %s656_s17, %s761_s17   ;;  %s613_s16 = sphi %s654_s16, %s760_s16   ;;  %s609_s15 = sphi %s652_s15, %s759_s15   ;;  %s605_s14 = sphi %s650_s14, %s758_s14   ;;  %s601_s13 = sphi %s648_s13, %s757_s13   ;;  %s597_s12 = sphi %s646_s12, %s756_s12  }
   0x5   : > { %p23_p0 = scmp.ge.s32.totalorder %s22_s19, 2  ;;  %s465_s21 = sadd.s32 4294967295, %s621_s18  }
   0x6   : > { %p83_p1 = scmp.ne.s32.totalorder %s601_s13, %s597_s12  ;;  %p84_p2 = scmp.eq.s32.totalorder %s621_s18, 0 }
   0x7   : > { %s763_s19 = smov (%p23_p0, %s22_s19), 0  ;;  %s765_s20 = smov (!%p23_p0, %s25_s20), %s617_s17 }
   0x8   : > { %p27_p3 = scmp.ge.s32.totalorder %s765_s20, 2  ;;  %p115_p4 = scmp.eq.s32.totalorder %s465_s21, 3 }
   0x9   : > { %s72_s22 = ssub.s32 %s613_s16, %s763_s19  ;;  %p85_p5 = por %p84_p2, %p83_p1 }
   0xa   : > { %s767_s20 = smov (%p27_p3, %s765_s20), 0  ;;  %p694_p6 = por %p115_p4, %p83_p1 }
   0xb   : > { %s71_s24 = ssub.s32 %s617_s17, %s767_s20  ;;  %s76_s26 = sadd.s32 1, %s601_s13 }
   0xc   : > { %s73_s25 = sor.u32 %s72_s22, %s71_s24  ;;  %p468_p8 = scmp.ge.s32.totalorder %s621_s18, 4 }
   0xd   : > { %p74_p7 = scmp.eq.s32.totalorder %s73_s25, 0 }
   0xe   : > { %143 = sbr.rel (%p468_p8) target bundleno = 31 (0x1f), region = 24 }
   0xf   : > { %s702_s27 = scalar_select %p74_p7, %s601_s13, %s76_s26  }
  0x15   : > { %146 = sbr.rel (!%p85_p5) target bundleno = 31 (0x1f), region = 28  ;;  %s148_s28 = sand.u32 (%p85_p5), 1, %s601_s13  }
  0x16   : > { %s501_s29 = smul.u32 (%p85_p5), 10, %s617_s17 }
  0x17   : > { %s500_s30 = smul.u32 (%p85_p5), 20, %s148_s28 }
  0x18   : > { %s152_s4 = sadd.s32 (%p85_p5), %s613_s16, %s501_s29 }
  0x19   : > { %s469_s5 = sshll.u32 (%p85_p5), %s152_s4, 2  ;;  %s150_s9 = scalar_lea.vmem (%p85_p5), [#allocation2], %s500_s30 }
  0x1a   : > { %s154_s8 = scalar_lea.vmem (%p85_p5), %s753_s2, %s469_s5 }
  0x1b   : > { %v170_v0 = vld [vmem:[%s154_s8] sm:$0xf] (%p85_p5)  ;;  %v172_v1 = vld [vmem:[%s154_s8 + $0x8] sm:$0xf] (%p85_p5)  ;;  %v174_v2 = vld [vmem:[%s154_s8 + $0x10] sm:$0xf] (%p85_p5) }
  0x1c   : > { %171 = vst [vmem:[%s150_s9] sm:$0xf] %v170_v0  ;;  %173 = vst [vmem:[%s150_s9 + $0x4] sm:$0xf] %v172_v1  ;;  %v176_v3 = vld [vmem:[%s154_s8 + $0x18] sm:$0xf] }
  0x1d   : > { %175 = vst [vmem:[%s150_s9 + $0x8] sm:$0xf] %v174_v2  ;;  %v178_v4 = vld [vmem:[%s154_s8 + $0x20] sm:$0xf]  ;;  %177 = vst [vmem:[%s150_s9 + $0xc] sm:$0xf] %v176_v3 }
  0x1e   : > { %179 = vst [vmem:[%s150_s9 + $0x10] sm:$0xf] %v178_v4 }
  0x1f PF: > { %p470_p9 = scmp.ge.s32.totalorder %s621_s18, 1  ;;  %p211_p10 = scmp.lt.s32.totalorder %s621_s18, 5 }
  0x21   : > { %p212_p11 = pnand %p470_p9, %p211_p10 }
  0x22   : > { %s218_s10 = sand.u32 (!%p212_p11), 1, %s597_s12   ;;  %v623_v5 = vmov (!%p212_p11), 0.0   ;;  %vm624_vm0 = vmmov (!%p212_p11), 0   ;;  %v248_v6 = vld [vmem:[%s752_s1] sm:$0xff] (!%p212_p11)  ;;  %v625_v7 = vmov (!%p212_p11), 0   ;;  %vm284_vm1 = vcmask (!%p212_p11), 1041408  }
  0x23   : > { %215 = sbr.rel (%p212_p11) target bundleno = 278 (0x116), region = 69  ;;  %490 = vmatprep.subr.bf16.mxu0 (!%p212_p11), %v623_v5  ;;  %496 = vmatprep.mubr.msk.bf16.mxu0 (!%p212_p11), %vm624_vm0, %v623_v5  ;;  %v249_v9 = vld [vmem:[%s752_s1 + $0x8] sm:$0xf] (!%p212_p11)  ;;  %v566_v13 = vld [vmem:[%s751_s0] sm:$0x3f] (!%p212_p11)   ;;  %vm280_vm2 = vcmask (!%p212_p11), 293888  }
  0x24   : > { %s502_s11 = smul.u32 (!%p212_p11), 20, %s218_s10  ;;  %562 = vset.pattern.permute.xlu0 (!%p212_p11), %v625_v7  ;;  %s471_s29 = sshll.u32 (!%p212_p11), %s218_s10, 3 }
  0x25   : > { %252 = vperm.xlu0 (!%p212_p11), %562, %v248_v6   ;;  %s239_s30 = scalar_lea.vmem (!%p212_p11), [#allocation3], %s471_s29 }
  0x26   : > { %s220_s24 = scalar_lea.vmem (!%p212_p11), [#allocation2], %s502_s11 }
  0x27   : > { %v563_v8 = vld [vmem:[%s220_s24] sm:$0xff] (!%p212_p11)   ;;  %v564_v10 = vld [vmem:[%s220_s24 + $0x8] sm:$0xff] (!%p212_p11)   ;;  %v565_v11 = vld [vmem:[%s220_s24 + $0x10] ss:$0 sps:$4 sm:$0x33] (!%p212_p11)  }
  0x28   : > { %491 = vmatpush3.bf16.msra.mxu0 (!%p212_p11), %v563_v8  ;;  %v286_v12 = vsel (!%p212_p11), %vm284_vm1, %v565_v11, 0 }
  0x29   : > { %492 = vmatprep.subr.bf16.mxu0 (!%p212_p11), %v623_v5  ;;  %257 = vperm.xlu0 (!%p212_p11), %562, %v249_v9  }
  0x2a   : > { %s480_s4 = sshll.u32 (%p694_p6), %s609_s15, 2 }
  0x2b   : > { %s347_s5 = sadd.s32 (%p694_p6), %s605_s14, %s480_s4 }
  0x2c   : > { %493 = vmatpush3.bf16.msra.mxu0 %v564_v10  ;;  %s481_s6 = sshll.u32 (%p694_p6), %s347_s5, 2 }
  0x2d   : > { %494 = vmatprep.subr.bf16.mxu0 %v623_v5  ;;  %s349_s9 = scalar_lea.vmem (%p694_p6), %s754_s3, %s481_s6 }
  0x30   : > { %495 = vmatpush3.bf16.msra.mxu0 %v286_v12 }
  0x33   : > { %497 = vmatmul.mubr.msk.bf16.vlgmr.msra.gmra.mrb[0].mxu0 %vm280_vm2, %v566_v13 }
  0xa4   : > { %v253_v14 = vpop.permute.xlu0 %252 }
  0xa8   : > { %v258_v18 = vpop.permute.xlu0 %257 }
 0x106   : > { %v322_v15 = vpop.f32.mrb[0].mxu0 }
 0x107   : > { %v323_v16 = vadd.f32 %v322_v15, %v253_v14  ;;  %v498_v17 = vpop.f32.mrb[1].mxu0  ;;  %345 = sbr.rel (!%p694_p6) target bundleno = 278 (0x116), region = 77 }
 0x108   : > { %v325_v19 = vpop.f32.mrb[2].mxu0 }
 0x109   : > { %v484_v20 = vpack.c.bf16 %v323_v16, %v323_v16  ;;  %v326_v21 = vadd.f32 %v325_v19, %v258_v18  ;;  %v499_v22 = vpop.f32.mrb[3].mxu0 }
 0x10b   : > { %337 = vst [vmem:[%s239_s30] sm:$0xf] %v484_v20  ;;  %v485_v23 = vpack.c.bf16 %v326_v21, %v326_v21 }
 0x10d   : > { %338 = vst [vmem:[%s239_s30 + $0x4] sm:$0x3] %v485_v23 }
 0x112   : > { %v365_v24 = vld [vmem:[%s239_s30] sm:$0xf] }
 0x113   : > { %366 = vst [vmem:[%s349_s9] sm:$0xf] %v365_v24 }
 0x114   : > { %v367_v25 = vld [vmem:[%s239_s30 + $0x4] sm:$0xf] }
 0x115   : > { %368 = vst [vmem:[%s349_s9 + $0x8] sm:$0xf] %v367_v25 }
 0x116 PF: > { %s13_s18 = sadd.s32 1, %s621_s18   ;;  %s756_s12 = smov %s601_s13 }
 0x117   : > { %p10_p12 = scmp.ge.s32.totalorder %s13_s18, 6   ;;  %s757_s13 = smov %s702_s27 }
 0x118   : > { %s758_s14 = smov %s613_s16  ;;  %s759_s15 = smov %s617_s17 }
 0x119   : > { %s760_s16 = smov %s763_s19  ;;  %s761_s17 = smov %s767_s20 }
 0x11a   :  { %12 = sbr.rel (!%p10_p12) target bundleno = 4 (0x4), region = 149 }

// kernel: da_module_forward.3
= control target key start
LH: loop header
LB: loop body
LE: loop exit
PB: predicated region body
PF: predicated region fallthrough
CT: control target
= control target key end

     0   :  { %s1547_s11 = smov 0   ;;  %s1549_s12 = smov 0   ;;  %s1953_s0 = inlined_call_operand.<no memory space> [shape: f32[1], index: 0, kind: input, shape index: {}]   ;;  %s1954_s1 = inlined_call_operand.vmem [shape: f32[1,256], index: 1, kind: input, shape index: {}]   ;;  %s1955_s2 = inlined_call_operand.vmem [shape: bf16[2,4,256], index: 2, kind: input, shape index: {}]   ;;  %s1956_s3 = inlined_call_operand.vmem [shape: bf16[2,4,256], index: 3, kind: input, shape index: {}]   ;;  %s1957_s4 = inlined_call_operand.vmem [shape: f32[2,4,256], index: 4, kind: input, shape index: {}]   ;;  %s1958_s5 = inlined_call_operand.vmem [shape: bf16[2,8,256], index: 5, kind: input, shape index: {}]   ;;  %s1959_s6 = inlined_call_operand.vmem [shape: f32[8,8], index: 6, kind: input, shape index: {}]   ;;  %s1960_s7 = inlined_call_operand.vmem [shape: f32[2,8,4], index: 7, kind: input, shape index: {}]   ;;  %s1961_s8 = inlined_call_operand.vmem [shape: f32[8,1], index: 8, kind: input, shape index: {}]   ;;  %s1962_s9 = inlined_call_operand.vmem [shape: f32[2,8,256], index: 9, kind: output, shape index: {}]  }
   0x1   :  { %14 = sst [smem:[#allocation2]] %s1953_s0  ;;  %s1551_s13 = smov 0  }
   0x2   :  { %s1553_s14 = smov 0   ;;  %s1555_s15 = smov 0  }
   0x3 LB: > { %s29_s0 = sadd.s32 1, %s1481_s13  ;;  %s32_s16 = sadd.s32 1, %s1485_s14  ;;  %s1489_s15 = sphi %s1555_s15, %s20_s15   ;;  %s1485_s14 = sphi %s1553_s14, %s1966_s14   ;;  %s1481_s13 = sphi %s1551_s13, %s1965_s13   ;;  %s1477_s12 = sphi %s1549_s12, %s1964_s12   ;;  %s1473_s11 = sphi %s1547_s11, %s1963_s11  }
   0x4   : > { %p30_p0 = scmp.ge.s32.totalorder %s29_s0, 2  ;;  %p1261_p1 = scmp.ge.s32.totalorder %s1489_s15, 1 }
   0x5   : > { %p351_p2 = scmp.lt.s32.totalorder %s1489_s15, 5 }
   0x6   : > { %s1968_s0 = smov (%p30_p0, %s29_s0), 0  ;;  %s1970_s16 = smov (!%p30_p0, %s32_s16), %s1485_s14 }
   0x7   : > { %p352_p3 = pnand %p1261_p1, %p351_p2  ;;  %p34_p4 = scmp.ge.s32.totalorder %s1970_s16, 2 }
   0x8   : > { %p415_p5 = scmp.lt.s32.totalorder (!%p352_p3), %s1477_s12, 1  ;;  %p417_p6 = scmp.lt.s32.totalorder (!%p352_p3), %s1473_s11, 1  ;;  %v1491_v0 = vmov (!%p352_p3), 0   ;;  %vm518_vm0 = vcmask (!%p352_p3), 1041408   ;;  %vm493_vm1 = vcmask (!%p352_p3), 31744   ;;  %v458_v13 = vlaneseq (!%p352_p3) }
   0x9   : > { %s1972_s16 = smov (%p34_p4, %s1970_s16), 0  ;;  %355 = sbr.rel (%p352_p3) target bundleno = 1162 (0x48a), region = 56 }
   0xa   : > { %557 = vmatprep.mubr.bf16.mxu0 (!%p352_p3), %v1491_v0  ;;  %1351 = vset.pattern.permute.xlu1 (!%p352_p3), %v1491_v0  ;;  %v459_v14 = vshrl.u32 (!%p352_p3), %v458_v13, 7  ;;  %v456_v16 = vld [vmem:[%s1954_s1] sm:$0x3] (!%p352_p3)  ;;  %vm959_vm2 = vcmask (!%p352_p3), 1043456   ;;  %vm1493_vm3 = vmmov (!%p352_p3), 0   ;;  %s1285_s29 = sshll.u32 (!%p352_p3), %s1473_s11, 7 }
   0xb   : > { %vm1033_vm4 = vcmask (!%p352_p3), 64512  }
   0xc   : > { %v460_v15 = vsub.s32 (!%p352_p3), 0, %v459_v14  ;;  %v464_v17 = vsub.s32 (!%p352_p3), 1, %v459_v14 }
   0xe   : > { %v1605_v18 = vrot.slane (!%p352_p3), %v456_v16, %v460_v15  ;;  %v1607_v19 = vrot.slane (!%p352_p3), %v456_v16, %v464_v17 }
  0x10   : > { %s1974_s12 = smov (!%p415_p5, %s1477_s12), 1 }
  0x11   : > { %s418_s17 = scalar_select %p417_p6, %s1473_s11, 1 }
  0x12   : > { %s1262_s18 = sshll.u32 %s1974_s12, 1  ;;  %s1292_s19 = sshll.u32 %s1974_s12, 2 }
  0x13   : > { %s1585_s20 = sadd.s32 %s1262_s18, %s418_s17  ;;  %s427_s23 = scalar_lea.vmem %s1956_s3, %s1292_s19 }
  0x14   : > { %s1263_s24 = sshll.u32 %s1585_s20, 1  ;;  %v1273_v1 = vld.sshfl [vmem:[%s427_s23] sm:$0x33 pattern:$0x76325410]  ;;  %s1267_s30 = sshll.u32 %s1585_s20, 2 }
  0x15   : > { %s422_s27 = scalar_lea.vmem %s1955_s2, %s1263_s24  ;;  %v492_v2 = vcombine.high %v1273_v1, %v1273_v1  ;;  %v520_v3 = vsel %vm518_vm0, %v1273_v1, 0  ;;  %s1293_s10 = sshll.u32 %s1974_s12, 3 }
  0x16   : > { %v454_v4 = vld [vmem:[%s422_s27] sm:$0x3]  ;;  %s1872_s19 = scalar_lea.vmem %s1958_s5, %s1293_s10  ;;  %s435_s23 = scalar_lea.vmem %s1957_s4, %s1267_s30 }
  0x17   : > { %468 = vxpose.xlu0.c.b16.start.end [1/1] (short) %v454_v4, 128  ;;  %1274 = vmatprep.subr.msk.bf16.mxu0 %vm518_vm0, %v492_v2  ;;  %s444_s26 = scalar_lea.vmem %s1960_s7, %s1293_s10  ;;  %s943_s30 = sshra.s32 %s1285_s29, 7 }
  0x18   : > { %526 = vmatpush1.bf16.msra.mxu0 %v520_v3  ;;  %s1286_s12 = sshll.u32 %s943_s30, 2  ;;  %s949_s17 = sld [smem:[#allocation2]] }
  0x19   : > { %s946_s18 = scalar_lea.vmem %s1872_s19, %s1286_s12  ;;  %s1272_s11 = sshll.u32 %s1585_s20, 3 }
  0x20   : > { %1352 = vset.pattern.permute.xlu0 %v1491_v0 }
  0x7d   : > { %v476_v5 = vpop.trf.xlu0 }
  0x7e   : > { %1275 = vmatmul.mubr.msk.bf16.vlgmr.msra.gmra.mrb[0].mxu0 %vm493_vm1, %v476_v5 }
  0x7f   : > { %567 = vmatprep.mubr.bf16.mxu0 %v1491_v0 }
  0x81   : > { %v477_v6 = vpop.trf.xlu0 }
  0x85   : > { %v478_v7 = vpop.trf.xlu0 }
  0x86   : > { %1276 = vmatmul.mubr.msk.bf16.gmra.mrb[4].mxu0 %vm493_vm1, %v477_v6 }
  0x87   : > { %577 = vmatprep.mubr.bf16.mxu0 %v1491_v0 }
  0x89   : > { %v479_v8 = vpop.trf.xlu0 }
  0x8d   : > { %v480_v9 = vpop.trf.xlu0 }
  0x8e   : > { %1277 = vmatmul.mubr.msk.bf16.gmra.mrb[8].mxu0 %vm493_vm1, %v478_v7 }
  0x8f   : > { %587 = vmatprep.mubr.bf16.mxu0 %v1491_v0 }
  0x91   : > { %v481_v10 = vpop.trf.xlu0 }
  0x95   : > { %v482_v11 = vpop.trf.xlu0 }
  0x96   : > { %1278 = vmatmul.mubr.msk.bf16.gmra.mrb[12].mxu0 %vm493_vm1, %v479_v8 }
  0x97   : > { %597 = vmatprep.mubr.bf16.mxu0 %v1491_v0 }
  0x99   : > { %v483_v12 = vpop.trf.xlu0 }
  0x9e   : > { %1279 = vmatmul.mubr.msk.bf16.gmra.mrb[16].mxu0 %vm493_vm1, %v480_v9 }
  0x9f   : > { %607 = vmatprep.mubr.bf16.mxu0 %v1491_v0 }
  0xa6   : > { %1280 = vmatmul.mubr.msk.bf16.gmra.mrb[20].mxu0 %vm493_vm1, %v481_v10 }
  0xa7   : > { %617 = vmatprep.mubr.bf16.mxu0 %v1491_v0 }
  0xae   : > { %1281 = vmatmul.mubr.msk.bf16.gmra.mrb[24].mxu0 %vm493_vm1, %v482_v11 }
  0xaf   : > { %627 = vmatprep.mubr.bf16.mxu0 %v1491_v0 }
  0xb6   : > { %1282 = vmatmul.mubr.msk.bf16.gmra.mrb[28].mxu0 %vm493_vm1, %v483_v12 }
 0x151   : > { %v559_v20 = vpop.f32.mrb[0].mxu0 }
 0x152   : > { %v1610_v21 = vadd.f32 %v559_v20, %v1605_v18  ;;  %v561_v22 = vpop.f32.mrb[1].mxu0 }
 0x153   : > { %v1613_v23 = vadd.f32 %v561_v22, %v1607_v19  ;;  %v563_v24 = vpop.f32.mrb[2].mxu0 }
 0x154   : > { %v1616_v25 = vadd.f32 %v563_v24, %v1605_v18  ;;  %v565_v26 = vpop.f32.mrb[3].mxu0 }
 0x155   : > { %v1619_v27 = vadd.f32 %v565_v26, %v1607_v19  ;;  %v638_v28 = vmax.f32 %v1610_v21, %v1613_v23 }
 0x157   : > { %639 = vmax.xlane.f32.xlu0 %v638_v28  ;;  %v641_v29 = vmax.f32 %v1616_v25, %v1619_v27 }
 0x159   : > { %642 = vmax.xlane.f32.xlu1 %v641_v29  ;;  %v569_v30 = vpop.f32.mrb[4].mxu0 }
 0x15a   : > { %v1626_v31 = vadd.f32 %v569_v30, %v1605_v18  ;;  %v571_v32 = vpop.f32.mrb[5].mxu0 }
 0x15b   : > { %v1629_v33 = vadd.f32 %v571_v32, %v1607_v19  ;;  %v573_v34 = vpop.f32.mrb[6].mxu0 }
 0x15c   : > { %v575_v35 = vpop.f32.mrb[7].mxu0  ;;  %v1632_v36 = vadd.f32 %v573_v34, %v1605_v18 }
 0x15d   : > { %v1635_v37 = vadd.f32 %v575_v35, %v1607_v19  ;;  %v644_v38 = vmax.f32 %v1626_v31, %v1629_v33 }
 0x15f   : > { %645 = vmax.xlane.f32.xlu1 %v644_v38  ;;  %v647_v40 = vmax.f32 %v1632_v36, %v1635_v37 }
 0x161   : > { %v579_v39 = vpop.f32.mrb[8].mxu0 }
 0x162   : > { %v1642_v41 = vadd.f32 %v579_v39, %v1605_v18  ;;  %v581_v42 = vpop.f32.mrb[9].mxu0 }
 0x163   : > { %v1645_v43 = vadd.f32 %v581_v42, %v1607_v19  ;;  %648 = vmax.xlane.f32.xlu1 %v647_v40  ;;  %v583_v44 = vpop.f32.mrb[10].mxu0 }
 0x164   : > { %v585_v45 = vpop.f32.mrb[11].mxu0  ;;  %v1648_v46 = vadd.f32 %v583_v44, %v1605_v18 }
 0x165   : > { %v1651_v47 = vadd.f32 %v585_v45, %v1607_v19  ;;  %v650_v48 = vmax.f32 %v1642_v41, %v1645_v43 }
 0x167   : > { %651 = vmax.xlane.f32.xlu1 %v650_v48  ;;  %v653_v50 = vmax.f32 %v1648_v46, %v1651_v47 }
 0x169   : > { %v589_v49 = vpop.f32.mrb[12].mxu0 }
 0x16a   : > { %v1658_v51 = vadd.f32 %v589_v49, %v1605_v18  ;;  %v591_v52 = vpop.f32.mrb[13].mxu0 }
 0x16b   : > { %v1661_v53 = vadd.f32 %v591_v52, %v1607_v19  ;;  %654 = vmax.xlane.f32.xlu1 %v653_v50  ;;  %v593_v54 = vpop.f32.mrb[14].mxu0 }
 0x16c   : > { %v595_v55 = vpop.f32.mrb[15].mxu0  ;;  %v1664_v56 = vadd.f32 %v593_v54, %v1605_v18 }
 0x16d   : > { %v1667_v57 = vadd.f32 %v595_v55, %v1607_v19  ;;  %v656_v58 = vmax.f32 %v1658_v51, %v1661_v53 }
 0x16f   : > { %657 = vmax.xlane.f32.xlu1 %v656_v58  ;;  %v659_v60 = vmax.f32 %v1664_v56, %v1667_v57 }
 0x171   : > { %v599_v59 = vpop.f32.mrb[16].mxu0 }
 0x172   : > { %v1674_v61 = vadd.f32 %v599_v59, %v1605_v18  ;;  %v601_v62 = vpop.f32.mrb[17].mxu0 }
 0x173   : > { %v1677_v63 = vadd.f32 %v601_v62, %v1607_v19  ;;  %660 = vmax.xlane.f32.xlu1 %v659_v60  ;;  %v603_v0 = vpop.f32.mrb[18].mxu0 }
 0x174   : > { %v605_v1 = vpop.f32.mrb[19].mxu0  ;;  %v1680_v2 = vadd.f32 %v603_v0, %v1605_v18 }
 0x175   : > { %v1683_v3 = vadd.f32 %v605_v1, %v1607_v19  ;;  %v662_v4 = vmax.f32 %v1674_v61, %v1677_v63 }
 0x177   : > { %663 = vmax.xlane.f32.xlu1 %v662_v4  ;;  %v665_v6 = vmax.f32 %v1680_v2, %v1683_v3 }
 0x179   : > { %v609_v5 = vpop.f32.mrb[20].mxu0 }
 0x17a   : > { %v1690_v7 = vadd.f32 %v609_v5, %v1605_v18  ;;  %v611_v8 = vpop.f32.mrb[21].mxu0 }
 0x17b   : > { %v1693_v9 = vadd.f32 %v611_v8, %v1607_v19  ;;  %666 = vmax.xlane.f32.xlu1 %v665_v6  ;;  %v613_v10 = vpop.f32.mrb[22].mxu0 }
 0x17c   : > { %v615_v11 = vpop.f32.mrb[23].mxu0  ;;  %v1696_v12 = vadd.f32 %v613_v10, %v1605_v18 }
 0x17d   : > { %v1699_v13 = vadd.f32 %v615_v11, %v1607_v19  ;;  %v668_v14 = vmax.f32 %v1690_v7, %v1693_v9 }
 0x17f   : > { %669 = vmax.xlane.f32.xlu1 %v668_v14  ;;  %v671_v16 = vmax.f32 %v1696_v12, %v1699_v13 }
 0x181   : > { %v619_v15 = vpop.f32.mrb[24].mxu0 }
 0x182   : > { %v1706_v17 = vadd.f32 %v619_v15, %v1605_v18  ;;  %v621_v20 = vpop.f32.mrb[25].mxu0 }
 0x183   : > { %v1709_v22 = vadd.f32 %v621_v20, %v1607_v19  ;;  %672 = vmax.xlane.f32.xlu1 %v671_v16  ;;  %v623_v24 = vpop.f32.mrb[26].mxu0 }
 0x184   : > { %v1712_v26 = vadd.f32 %v623_v24, %v1605_v18  ;;  %v625_v28 = vpop.f32.mrb[27].mxu0 }
 0x185   : > { %v1715_v29 = vadd.f32 %v625_v28, %v1607_v19  ;;  %v674_v30 = vmax.f32 %v1706_v17, %v1709_v22 }
 0x187   : > { %675 = vmax.xlane.f32.xlu1 %v674_v30  ;;  %v677_v32 = vmax.f32 %v1712_v26, %v1715_v29 }
 0x189   : > { %678 = vmax.xlane.f32.xlu0 %v677_v32  ;;  %v629_v34 = vpop.f32.mrb[28].mxu0 }
 0x18a   : > { %v1722_v35 = vadd.f32 %v629_v34, %v1605_v18  ;;  %v631_v38 = vpop.f32.mrb[29].mxu0 }
 0x18b   : > { %v1725_v39 = vadd.f32 %v631_v38, %v1607_v19  ;;  %v633_v40 = vpop.f32.mrb[30].mxu0 }
 0x18c   : > { %v1728_v42 = vadd.f32 %v633_v40, %v1605_v18  ;;  %v635_v44 = vpop.f32.mrb[31].mxu0 }
 0x18d   : > { %v1731_v45 = vadd.f32 %v635_v44, %v1607_v19  ;;  %v680_v48 = vmax.f32 %v1722_v35, %v1725_v39 }
 0x18f   : > { %681 = vmax.xlane.f32.xlu1 %v680_v48  ;;  %v683_v49 = vmax.f32 %v1728_v42, %v1731_v45 }
 0x191   : > { %684 = vmax.xlane.f32.xlu0 %v683_v49 }
 0x1e4   : > { %v640_v50 = vpop.xlane.xlu0 %639 }
 0x1e5   : > { %v686_v52 = vsub.f32 %v1610_v21, %v640_v50  ;;  %v687_v54 = vsub.f32 %v1613_v23, %v640_v50 }
 0x1e6   : > { %v643_v55 = vpop.xlane.xlu1 %642 }
 0x1e7   : > { %v718_v18 = vmul.f32 1.442695, %v686_v52  ;;  %v720_v58 = vmul.f32 1.442695, %v687_v54  ;;  %v688_v59 = vsub.f32 %v1616_v25, %v643_v55  ;;  %v689_v19 = vsub.f32 %v1619_v27, %v643_v55 }
 0x1e9   : > { %1355 = vpow2.f32 %v718_v18  ;;  %v722_v60 = vmul.f32 1.442695, %v688_v59  ;;  %v724_v62 = vmul.f32 1.442695, %v689_v19 }
 0x1ea   : > { %1357 = vpow2.f32 %v720_v58 }
 0x1eb   : > { %1359 = vpow2.f32 %v722_v60 }
 0x1ec   : > { %1361 = vpow2.f32 %v724_v62  ;;  %v646_v0 = vpop.xlane.xlu1 %645 }
 0x1ed   : > { %v690_v1 = vsub.f32 %v1626_v31, %v646_v0  ;;  %v691_v21 = vsub.f32 %v1629_v33, %v646_v0 }
 0x1ef   : > { %v726_v4 = vmul.f32 1.442695, %v690_v1  ;;  %v728_v23 = vmul.f32 1.442695, %v691_v21 }
 0x1f0   : > { %v649_v5 = vpop.xlane.xlu1 %648 }
 0x1f1   : > { %1363 = vpow2.f32 %v726_v4  ;;  %v692_v6 = vsub.f32 %v1632_v36, %v649_v5  ;;  %v693_v25 = vsub.f32 %v1635_v37, %v649_v5 }
 0x1f2   : > { %1365 = vpow2.f32 %v728_v23 }
 0x1f3   : > { %v1745_v27 = vpop.eup %1355  ;;  %v730_v8 = vmul.f32 1.442695, %v692_v6  ;;  %v732_v10 = vmul.f32 1.442695, %v693_v25 }
 0x1f4   : > { %v1747_v11 = vpop.eup %1357  ;;  %v652_v14 = vpop.xlane.xlu1 %651 }
 0x1f5   : > { %v1749_v15 = vpop.eup %1359  ;;  %1367 = vpow2.f32 %v730_v8  ;;  %v694_v31 = vsub.f32 %v1642_v41, %v652_v14  ;;  %v695_v33 = vsub.f32 %v1645_v43, %v652_v14  ;;  %v782_v36 = vadd.f32 %v1747_v11, %v1745_v27 }
 0x1f6   : > { %v1755_v16 = vpop.eup %1361  ;;  %1369 = vpow2.f32 %v732_v10 }
 0x1f7   : > { %v734_v37 = vmul.f32 1.442695, %v694_v31  ;;  %v736_v20 = vmul.f32 1.442695, %v695_v33  ;;  %783 = vadd.xlane.f32.xlu1 %v782_v36  ;;  %v785_v24 = vadd.f32 %v1755_v16, %v1749_v15 }
 0x1f8   : > { %v655_v28 = vpop.xlane.xlu1 %654 }
 0x1f9   : > { %1371 = vpow2.f32 %v734_v37  ;;  %v696_v30 = vsub.f32 %v1648_v46, %v655_v28  ;;  %v697_v41 = vsub.f32 %v1651_v47, %v655_v28  ;;  %786 = vadd.xlane.f32.xlu0 %v785_v24 }
 0x1fa   : > { %1373 = vpow2.f32 %v736_v20 }
 0x1fb   : > { %v1761_v43 = vpop.eup %1363  ;;  %v738_v32 = vmul.f32 1.442695, %v696_v30  ;;  %v740_v34 = vmul.f32 1.442695, %v697_v41 }
 0x1fc   : > { %v1763_v38 = vpop.eup %1365  ;;  %v658_v40 = vpop.xlane.xlu1 %657 }
 0x1fd   : > { %1375 = vpow2.f32 %v738_v32  ;;  %v698_v44 = vsub.f32 %v1658_v51, %v658_v40  ;;  %v699_v48 = vsub.f32 %v1661_v53, %v658_v40  ;;  %v788_v49 = vadd.f32 %v1763_v38, %v1761_v43 }
 0x1fe   : > { %1377 = vpow2.f32 %v740_v34 }
 0x1ff   : > { %v1769_v46 = vpop.eup %1367  ;;  %v742_v47 = vmul.f32 1.442695, %v698_v44  ;;  %v744_v50 = vmul.f32 1.442695, %v699_v48  ;;  %789 = vadd.xlane.f32.xlu1 %v788_v49 }
 0x200   : > { %v1771_v52 = vpop.eup %1369  ;;  %v661_v54 = vpop.xlane.xlu1 %660 }
 0x201   : > { %1379 = vpow2.f32 %v742_v47  ;;  %v700_v55 = vsub.f32 %v1664_v56, %v661_v54  ;;  %v701_v18 = vsub.f32 %v1667_v57, %v661_v54  ;;  %v791_v51 = vadd.f32 %v1771_v52, %v1769_v46 }
 0x202   : > { %1381 = vpow2.f32 %v744_v50 }
 0x203   : > { %v1777_v53 = vpop.eup %1371  ;;  %v746_v58 = vmul.f32 1.442695, %v700_v55  ;;  %v748_v59 = vmul.f32 1.442695, %v701_v18  ;;  %792 = vadd.xlane.f32.xlu0 %v791_v51 }
 0x204   : > { %v1779_v19 = vpop.eup %1373  ;;  %v664_v60 = vpop.xlane.xlu1 %663 }
 0x205   : > { %1383 = vpow2.f32 %v746_v58  ;;  %v702_v62 = vsub.f32 %v1674_v61, %v664_v60  ;;  %v703_v0 = vsub.f32 %v1677_v63, %v664_v60  ;;  %v794_v56 = vadd.f32 %v1779_v19, %v1777_v53 }
 0x206   : > { %1385 = vpow2.f32 %v748_v59 }
 0x207   : > { %v1785_v57 = vpop.eup %1375  ;;  %v750_v1 = vmul.f32 1.442695, %v702_v62  ;;  %v752_v21 = vmul.f32 1.442695, %v703_v0  ;;  %795 = vadd.xlane.f32.xlu1 %v794_v56 }
 0x208   : > { %v1787_v4 = vpop.eup %1377  ;;  %v667_v23 = vpop.xlane.xlu1 %666 }
 0x209   : > { %1387 = vpow2.f32 %v750_v1  ;;  %v704_v5 = vsub.f32 %v1680_v2, %v667_v23  ;;  %v705_v6 = vsub.f32 %v1683_v3, %v667_v23  ;;  %v797_v61 = vadd.f32 %v1787_v4, %v1785_v57 }
 0x20a   : > { %1389 = vpow2.f32 %v752_v21 }
 0x20b   : > { %v1793_v63 = vpop.eup %1379  ;;  %v754_v25 = vmul.f32 1.442695, %v704_v5  ;;  %v756_v8 = vmul.f32 1.442695, %v705_v6  ;;  %798 = vadd.xlane.f32.xlu0 %v797_v61 }
 0x20c   : > { %v1795_v10 = vpop.eup %1381  ;;  %v670_v14 = vpop.xlane.xlu1 %669 }
 0x20d   : > { %1391 = vpow2.f32 %v754_v25  ;;  %v706_v31 = vsub.f32 %v1690_v7, %v670_v14  ;;  %v707_v33 = vsub.f32 %v1693_v9, %v670_v14  ;;  %v800_v2 = vadd.f32 %v1795_v10, %v1793_v63 }
 0x20e   : > { %1393 = vpow2.f32 %v756_v8 }
 0x20f   : > { %v1801_v3 = vpop.eup %1383  ;;  %v758_v36 = vmul.f32 1.442695, %v706_v31  ;;  %v760_v37 = vmul.f32 1.442695, %v707_v33  ;;  %801 = vadd.xlane.f32.xlu1 %v800_v2 }
 0x210   : > { %v1803_v20 = vpop.eup %1385  ;;  %v673_v24 = vpop.xlane.xlu1 %672 }
 0x211   : > { %1395 = vpow2.f32 %v758_v36  ;;  %v708_v28 = vsub.f32 %v1696_v12, %v673_v24  ;;  %v709_v30 = vsub.f32 %v1699_v13, %v673_v24  ;;  %v803_v7 = vadd.f32 %v1803_v20, %v1801_v3 }
 0x212   : > { %1397 = vpow2.f32 %v760_v37 }
 0x213   : > { %v1809_v9 = vpop.eup %1387  ;;  %v762_v41 = vmul.f32 1.442695, %v708_v28  ;;  %v764_v32 = vmul.f32 1.442695, %v709_v30  ;;  %804 = vadd.xlane.f32.xlu0 %v803_v7  ;;  %v1875_v30 = vld [vmem:[%s1872_s19] sm:$0xff] }
 0x214   : > { %v1811_v34 = vpop.eup %1389  ;;  %v676_v40 = vpop.xlane.xlu1 %675  ;;  %v1284_v7 = vcombine.high %v1875_v30, %v1875_v30 }
 0x215   : > { %1399 = vpow2.f32 %v762_v41  ;;  %v710_v44 = vsub.f32 %v1706_v17, %v676_v40  ;;  %v711_v48 = vsub.f32 %v1709_v22, %v676_v40  ;;  %v806_v12 = vadd.f32 %v1811_v34, %v1809_v9  ;;  %v955_v41 = vld [vmem:[%s435_s23] sm:$0xf]  ;;  %s452_s23 = scalar_lea.vmem %s1962_s9, %s1272_s11 }
 0x216   : > { %1401 = vpow2.f32 %v764_v32  ;;  %v679_v13 = vpop.xlane.xlu0 %678  ;;  %934 = vmatprep.mubr.bf16.mxu1 %v1284_v7  ;;  %v1492_v32 = vmov 0.0  }
 0x217   : > { %v1817_v49 = vpop.eup %1391  ;;  %v766_v47 = vmul.f32 1.442695, %v710_v44  ;;  %v768_v50 = vmul.f32 1.442695, %v711_v48  ;;  %807 = vadd.xlane.f32.xlu1 %v806_v12  ;;  %v712_v54 = vsub.f32 %v1712_v26, %v679_v13  ;;  %v713_v55 = vsub.f32 %v1715_v29, %v679_v13  ;;  %1298 = vmatprep.subr.mxu0 %v1492_v32 }
 0x218   : > { %v1821_v18 = vpop.eup %1393  ;;  %1299 = vmatpush3.msk.msra.mxu0 %vm959_vm2, %v955_v41  ;;  %1300 = vmatprep.mubr.msk.f32.mxu0 %vm1493_vm3, %v1492_v32 }
 0x219   : > { %1403 = vpow2.f32 %v766_v47  ;;  %v770_v17 = vmul.f32 1.442695, %v712_v54  ;;  %v772_v51 = vmul.f32 1.442695, %v713_v55  ;;  %v809_v22 = vadd.f32 %v1821_v18, %v1817_v49  ;;  %1303 = vmatprep.subr.mxu0 %v1492_v32 }
 0x21a   : > { %1405 = vpow2.f32 %v768_v50 }
 0x21b   : > { %v1825_v58 = vpop.eup %1395  ;;  %1407 = vpow2.f32 %v770_v17  ;;  %810 = vadd.xlane.f32.xlu0 %v809_v22 }
 0x21c   : > { %v1827_v59 = vpop.eup %1397  ;;  %1409 = vpow2.f32 %v772_v51  ;;  %v682_v60 = vpop.xlane.xlu1 %681 }
 0x21d   : > { %v714_v26 = vsub.f32 %v1722_v35, %v682_v60  ;;  %v715_v29 = vsub.f32 %v1725_v39, %v682_v60  ;;  %v812_v62 = vadd.f32 %v1827_v59, %v1825_v58 }
 0x21e   : > { %v685_v0 = vpop.xlane.xlu0 %684 }
 0x21f   : > { %v1833_v56 = vpop.eup %1399  ;;  %v774_v1 = vmul.f32 1.442695, %v714_v26  ;;  %v776_v21 = vmul.f32 1.442695, %v715_v29  ;;  %813 = vadd.xlane.f32.xlu1 %v812_v62  ;;  %v716_v23 = vsub.f32 %v1728_v42, %v685_v0  ;;  %v717_v5 = vsub.f32 %v1731_v45, %v685_v0 }
 0x220   : > { %v1837_v6 = vpop.eup %1401 }
 0x221   : > { %1411 = vpow2.f32 %v774_v1  ;;  %v778_v61 = vmul.f32 1.442695, %v716_v23  ;;  %v780_v35 = vmul.f32 1.442695, %v717_v5  ;;  %v815_v39 = vadd.f32 %v1837_v6, %v1833_v56 }
 0x222   : > { %1413 = vpow2.f32 %v776_v21 }
 0x223   : > { %v1841_v25 = vpop.eup %1403  ;;  %1415 = vpow2.f32 %v778_v61  ;;  %816 = vadd.xlane.f32.xlu0 %v815_v39 }
 0x224   : > { %v1843_v8 = vpop.eup %1405  ;;  %1417 = vpow2.f32 %v780_v35 }
 0x225   : > { %v1845_v42 = vpop.eup %1407  ;;  %v818_v45 = vadd.f32 %v1843_v8, %v1841_v25 }
 0x226   : > { %v1849_v14 = vpop.eup %1409 }
 0x227   : > { %819 = vadd.xlane.f32.xlu1 %v818_v45  ;;  %v821_v31 = vadd.f32 %v1849_v14, %v1845_v42 }
 0x229   : > { %822 = vadd.xlane.f32.xlu0 %v821_v31 }
 0x22b   : > { %v1853_v33 = vpop.eup %1411 }
 0x22c   : > { %v1855_v2 = vpop.eup %1413 }
 0x22d   : > { %v1857_v36 = vpop.eup %1415  ;;  %v824_v37 = vadd.f32 %v1855_v2, %v1853_v33 }
 0x22e   : > { %v1861_v24 = vpop.eup %1417 }
 0x22f   : > { %825 = vadd.xlane.f32.xlu1 %v824_v37  ;;  %v827_v28 = vadd.f32 %v1861_v24, %v1857_v36 }
 0x231   : > { %828 = vadd.xlane.f32.xlu0 %v827_v28 }
 0x284   : > { %v784_v40 = vpop.xlane.xlu1 %783 }
 0x285   : > { %1419 = vrcp.f32 %v784_v40 }
 0x286   : > { %v787_v44 = vpop.xlane.xlu0 %786 }
 0x287   : > { %1421 = vrcp.f32 %v787_v44 }
 0x28c   : > { %v790_v48 = vpop.xlane.xlu1 %789 }
 0x28d   : > { %1423 = vrcp.f32 %v790_v48 }
 0x28f   : > { %v1420_v12 = vpop.eup %1419 }
 0x290   : > { %v793_v13 = vpop.xlane.xlu0 %792  ;;  %v847_v50 = vmul.f32 %v1420_v12, %v1747_v11  ;;  %v846_v55 = vmul.f32 %v1420_v12, %v1745_v27 }
 0x291   : > { %v1422_v47 = vpop.eup %1421  ;;  %1425 = vrcp.f32 %v793_v13 }
 0x292   : > { %v849_v54 = vmul.f32 %v1422_v47, %v1755_v16  ;;  %v848_v17 = vmul.f32 %v1422_v47, %v1749_v15 }
 0x294   : > { %v796_v51 = vpop.xlane.xlu1 %795  ;;  %v879_v22 = vpack.c.bf16 %v849_v54, %v847_v50  ;;  %v878_v60 = vpack.c.bf16 %v848_v17, %v846_v55 }
 0x295   : > { %1427 = vrcp.f32 %v796_v51 }
 0x296   : > { %902 = vmatprep.subr.bf16.mxu1 %v879_v22 }
 0x297   : > { %903 = vmatpush1.bf16.xpose.msra.mxu1 %v878_v60  ;;  %v1424_v29 = vpop.eup %1423 }
 0x298   : > { %v799_v26 = vpop.xlane.xlu0 %798  ;;  %v851_v1 = vmul.f32 %v1424_v29, %v1763_v38  ;;  %v850_v16 = vmul.f32 %v1424_v29, %v1761_v43 }
 0x299   : > { %1429 = vrcp.f32 %v799_v26 }
 0x29b   : > { %v1426_v62 = vpop.eup %1425 }
 0x29c   : > { %v802_v0 = vpop.xlane.xlu1 %801  ;;  %v853_v11 = vmul.f32 %v1426_v62, %v1771_v52  ;;  %v852_v27 = vmul.f32 %v1426_v62, %v1769_v46 }
 0x29d   : > { %1431 = vrcp.f32 %v802_v0 }
 0x29e   : > { %v881_v15 = vpack.c.bf16 %v853_v11, %v851_v1  ;;  %v880_v21 = vpack.c.bf16 %v852_v27, %v850_v16 }
 0x29f   : > { %v1428_v5 = vpop.eup %1427 }
 0x2a0   : > { %904 = vmatprep.subr.bf16.mxu1 %v881_v15  ;;  %v805_v23 = vpop.xlane.xlu0 %804  ;;  %v855_v39 = vmul.f32 %v1428_v5, %v1779_v19  ;;  %v854_v52 = vmul.f32 %v1428_v5, %v1777_v53 }
 0x2a1   : > { %1433 = vrcp.f32 %v805_v23  ;;  %905 = vmatpush1.bf16.xpose.msra.mxu1 %v880_v21 }
 0x2a3   : > { %v1430_v61 = vpop.eup %1429 }
 0x2a4   : > { %v808_v35 = vpop.xlane.xlu1 %807  ;;  %v857_v38 = vmul.f32 %v1430_v61, %v1787_v4  ;;  %v856_v43 = vmul.f32 %v1430_v61, %v1785_v57 }
 0x2a5   : > { %1435 = vrcp.f32 %v808_v35 }
 0x2a6   : > { %v883_v45 = vpack.c.bf16 %v857_v38, %v855_v39  ;;  %v882_v46 = vpack.c.bf16 %v856_v43, %v854_v52  ;;  %v953_v38 = vld [vmem:[%s1959_s6] sm:$0xff] }
 0x2a7   : > { %v1432_v37 = vpop.eup %1431 }
 0x2a8   : > { %906 = vmatprep.subr.bf16.mxu1 %v883_v45  ;;  %v811_v31 = vpop.xlane.xlu0 %810  ;;  %v859_v41 = vmul.f32 %v1432_v37, %v1795_v10  ;;  %v858_v4 = vmul.f32 %v1432_v37, %v1793_v63 }
 0x2a9   : > { %1437 = vrcp.f32 %v811_v31  ;;  %907 = vmatpush1.bf16.xpose.msra.mxu1 %v882_v46 }
 0x2ab   : > { %v1434_v28 = vpop.eup %1433 }
 0x2ac   : > { %v814_v7 = vpop.xlane.xlu1 %813  ;;  %v861_v19 = vmul.f32 %v1434_v28, %v1803_v20  ;;  %v860_v53 = vmul.f32 %v1434_v28, %v1801_v3 }
 0x2ad   : > { %1439 = vrcp.f32 %v814_v7 }
 0x2ae   : > { %v885_v40 = vpack.c.bf16 %v861_v19, %v859_v41  ;;  %v884_v57 = vpack.c.bf16 %v860_v53, %v858_v4 }
 0x2af   : > { %v1436_v48 = vpop.eup %1435 }
 0x2b0   : > { %908 = vmatprep.subr.bf16.mxu1 %v885_v40  ;;  %v817_v44 = vpop.xlane.xlu0 %816  ;;  %v863_v47 = vmul.f32 %v1436_v48, %v1811_v34  ;;  %v862_v20 = vmul.f32 %v1436_v48, %v1809_v9 }
 0x2b1   : > { %1441 = vrcp.f32 %v817_v44  ;;  %909 = vmatpush1.bf16.xpose.msra.mxu1 %v884_v57 }
 0x2b3   : > { %v1438_v12 = vpop.eup %1437 }
 0x2b4   : > { %v820_v13 = vpop.xlane.xlu1 %819  ;;  %v865_v10 = vmul.f32 %v1438_v12, %v1821_v18  ;;  %v864_v63 = vmul.f32 %v1438_v12, %v1817_v49 }
 0x2b5   : > { %1443 = vrcp.f32 %v820_v13 }
 0x2b6   : > { %v823_v3 = vpop.xlane.xlu0 %822  ;;  %v887_v50 = vpack.c.bf16 %v865_v10, %v863_v47  ;;  %v886_v54 = vpack.c.bf16 %v864_v63, %v862_v20 }
 0x2b7   : > { %1445 = vrcp.f32 %v823_v3  ;;  %v1440_v55 = vpop.eup %1439 }
 0x2b8   : > { %910 = vmatprep.subr.bf16.mxu1 %v887_v50  ;;  %v867_v22 = vmul.f32 %v1440_v55, %v1827_v59  ;;  %v866_v18 = vmul.f32 %v1440_v55, %v1825_v58 }
 0x2b9   : > { %911 = vmatpush1.bf16.xpose.msra.mxu1 %v886_v54 }
 0x2bb   : > { %v1442_v17 = vpop.eup %1441 }
 0x2bc   : > { %v826_v51 = vpop.xlane.xlu1 %825  ;;  %v869_v34 = vmul.f32 %v1442_v17, %v1837_v6  ;;  %v868_v9 = vmul.f32 %v1442_v17, %v1833_v56 }
 0x2bd   : > { %1447 = vrcp.f32 %v826_v51 }
 0x2be   : > { %v829_v49 = vpop.xlane.xlu0 %828  ;;  %v889_v60 = vpack.c.bf16 %v869_v34, %v867_v22  ;;  %v888_v26 = vpack.c.bf16 %v868_v9, %v866_v18 }
 0x2bf   : > { %v1444_v29 = vpop.eup %1443  ;;  %1449 = vrcp.f32 %v829_v49 }
 0x2c0   : > { %912 = vmatprep.subr.bf16.mxu1 %v889_v60  ;;  %v871_v0 = vmul.f32 %v1444_v29, %v1843_v8  ;;  %v870_v58 = vmul.f32 %v1444_v29, %v1841_v25  ;;  %v1283_v25 = vcombine.low %v1875_v30, %v1875_v30 }
 0x2c1   : > { %v1446_v62 = vpop.eup %1445  ;;  %913 = vmatpush1.bf16.xpose.msra.mxu1 %v888_v26 }
 0x2c2   : > { %v873_v1 = vmul.f32 %v1446_v62, %v1849_v14  ;;  %v872_v59 = vmul.f32 %v1446_v62, %v1845_v42 }
 0x2c4   : > { %v891_v6 = vpack.c.bf16 %v873_v1, %v871_v0  ;;  %v890_v11 = vpack.c.bf16 %v872_v59, %v870_v58 }
 0x2c6   : > { %914 = vmatprep.subr.bf16.mxu1 %v891_v6 }
 0x2c7   : > { %v1448_v56 = vpop.eup %1447 }
 0x2c8   : > { %v875_v27 = vmul.f32 %v1448_v56, %v1855_v2  ;;  %v874_v14 = vmul.f32 %v1448_v56, %v1853_v33  ;;  %v954_v2 = vld [vmem:[%s444_s26] sm:$0xff] }
 0x2c9   : > { %v1450_v16 = vpop.eup %1449  ;;  %915 = vmatpush1.bf16.xpose.msra.mxu1 %v890_v11  ;;  %1301 = vmatmul.mubr.msk.f32.vlgmr.msra.gmra.mrb[32].mxu0 %vm493_vm1, %v954_v2  ;;  %v1107_v33 = vld [vmem:[%s1961_s8] sm:$0xff] }
 0x2ca   : > { %v877_v15 = vmul.f32 %v1450_v16, %v1861_v24  ;;  %v876_v21 = vmul.f32 %v1450_v16, %v1857_v36  ;;  %1305 = vmatprep.mubr.msk.f32.mxu0 %vm1493_vm3, %v1492_v32  ;;  %1110 = vperm.xlu1 %1351, %v1107_v33   ;;  %v947_v36 = vld [vmem:[%s946_s18] sm:$0xf]  ;;  %v950_v24 = vstv %s949_s17 }
 0x2cb   : > { %v948_v30 = vunpack.c.l.bf16 %v947_v36 }
 0x2cc   : > { %v893_v8 = vpack.c.bf16 %v877_v15, %v875_v27  ;;  %v892_v42 = vpack.c.bf16 %v876_v21, %v874_v14 }
 0x2ce   : > { %916 = vmatprep.subr.bf16.mxu1 %v893_v8 }
 0x2d1   : > { %917 = vmatpush1.bf16.xpose.msra.mxu1 %v892_v42 }
 0x2d8   : > { %935 = vmatmul.mubr.bf16.vlgmr.msra.gmra.mrb[0].mxu1 %v1283_v25 }
 0x349   : > { %v1111_v46 = vpop.permute.xlu1 %1110 }
 0x39c   : > { %v1029_v52 = vpop.f32.mrb[32].mxu0 }
 0x39d   : > { %v1302_v43 = vpop.f32.mrb[33].mxu0 }
 0x3ab   : > { %v936_v23 = vpop.f32.mrb[0].mxu1 }
 0x3ac   : > { %v951_v5 = vmul.f32 %v950_v24, %v936_v23  ;;  %v938_v61 = vpop.f32.mrb[1].mxu1 }
 0x3ad   : > { %v939_v35 = vpop.f32.mrb[2].mxu1 }
 0x3ae   : > { %v952_v39 = vadd.f32 %v951_v5, %v948_v30  ;;  %v940_v32 = vpop.f32.mrb[3].mxu1 }
 0x3b0   : > { %1304 = vmatpush3.msra.mxu0 %v952_v39 }
 0x3b1   : > { %1306 = vmatmul.mubr.msk.f32.vlgmr.msra.gmra.mrb[34].mxu0 %vm1033_vm4, %v953_v38 }
 0x484   : > { %v1103_v45 = vpop.f32.mrb[34].mxu0 }
 0x485   : > { %v1104_v31 = vadd.f32 %v1103_v45, %v1029_v52  ;;  %v1307_v37 = vpop.f32.mrb[35].mxu0 }
 0x487   : > { %v1113_v28 = vadd.f32 %v1111_v46, %v1104_v31 }
 0x489   : > { %1114 = vst [vmem:[%s452_s23] sm:$0xff] %v1113_v28 }
 0x48a PF: > { %s20_s15 = sadd.s32 1, %s1489_s15   ;;  %s1963_s11 = smov %s1481_s13 }
 0x48b   : > { %p17_p7 = scmp.ge.s32.totalorder %s20_s15, 6   ;;  %s1964_s12 = smov %s1485_s14 }
 0x48c   : > { %s1965_s13 = smov %s1968_s0  ;;  %s1966_s14 = smov %s1972_s16 }
 0x48d   :  { %19 = sbr.rel (!%p17_p7) target bundleno = 3 (0x3), region = 99 }

</bundles_post_ra>
